<compile_context>
chip_gen: v7x
topology: tpu7x:2x2x1
jax: 0.10.0
libtpu: 0.0.40
codegen_flags: <defaults>
</compile_context>

<pallas_src>
import math
import jax
import jax.numpy as jnp
from jax import lax
from jax.experimental import pallas as pl
from jax.experimental.pallas import tpu as pltpu

SCALE = 10.0  # model.scale_factor; qk.div(1/scale) == qk * scale


# ---------------------------------------------------------------------------
# Stage 1: per-batch K/V projection (hoisted out of the attention kernel).
# ---------------------------------------------------------------------------
def kv_project_kernel(k_in_ref, v_in_ref, wk_ref, wv_ref, bk_ref, bv_ref,
                      k_out_ref, v_out_ref):
    xk = k_in_ref[0].astype(jnp.bfloat16)                       # (S, D)
    xv = v_in_ref[0].astype(jnp.bfloat16)                       # (S, D)
    k = jnp.dot(xk, wk_ref[...], preferred_element_type=jnp.float32) + bk_ref[...]
    v = jnp.dot(xv, wv_ref[...], preferred_element_type=jnp.float32) + bv_ref[...]
    k_out_ref[0] = k.astype(jnp.bfloat16)
    v_out_ref[0] = v.astype(jnp.bfloat16)


def project_kv(key, value, wk_t, wv_t, bk2, bv2):
    B, S, D = key.shape
    io_spec = pl.BlockSpec((1, S, D), lambda b: (b, 0, 0))
    w_spec = pl.BlockSpec((D, D), lambda b: (0, 0), pipeline_mode=pl.Buffered(1))
    b_spec = pl.BlockSpec((1, D), lambda b: (0, 0), pipeline_mode=pl.Buffered(1))
    return pl.pallas_call(
        kv_project_kernel,
        out_shape=(jax.ShapeDtypeStruct((B, S, D), jnp.bfloat16),
                   jax.ShapeDtypeStruct((B, S, D), jnp.bfloat16)),
        grid_spec=pltpu.PrefetchScalarGridSpec(
            num_scalar_prefetch=0,
            grid=(B,),
            in_specs=[io_spec, io_spec, w_spec, w_spec, b_spec, b_spec],
            out_specs=[io_spec, io_spec],
        ),
        compiler_params=pltpu.CompilerParams(
            dimension_semantics=("parallel",),
            vmem_limit_bytes=32 * 1024 * 1024,
        ),
    )(key, value, wk_t, wv_t, bk2, bv2)


# ---------------------------------------------------------------------------
# Stage 2: attention over pre-projected bf16 K/V.  No cross-tile state, so
# both grid axes are "parallel".
# ---------------------------------------------------------------------------
def attention_kernel(q_in_ref, k_ref, v_ref, wq_ref, bq_ref,
                     out_ref, softmax_ref):
    # Q projection; SCALE is already folded into wq/bq by the wrapper.
    xq = q_in_ref[0].astype(jnp.bfloat16)                        # (TQ, D)
    q = (jnp.dot(xq, wq_ref[...], preferred_element_type=jnp.float32)
         + bq_ref[...]).astype(jnp.bfloat16)                     # (TQ, D)

    # qk = (scale*q) @ k^T  -> (TQ, S)
    qk = lax.dot_general(q, k_ref[0], (((1,), (1,)), ((), ())),
                         preferred_element_type=jnp.float32)

    # softmax along the key axis; exact normalization (softmax_qk is a
    # user-visible output, rows must sum to 1).
    m = jnp.max(qk, axis=-1, keepdims=True)
    e = jnp.exp(qk - m)
    s = jnp.sum(e, axis=-1, keepdims=True)
    p = e / s

    # dropout(p=0.25) in eval mode == identity.
    out = jnp.dot(p.astype(jnp.bfloat16), v_ref[0],
                  preferred_element_type=jnp.float32)            # (TQ, D)

    out_ref[0] = out.astype(out_ref.dtype)
    softmax_ref[0] = p.astype(softmax_ref.dtype)


def model_forward(query, key, value, wq, wk, wv, bq, bk, bv, *, tq=128):
    B, S, D = query.shape
    tq = min(tq, S)
    assert S % tq == 0, "sequence length must be divisible by the query tile"
    n_q = S // tq

    # PyTorch Linear weights are (out, in): transpose to (in, out), cast bf16.
    # Fold SCALE into the Q projection: softmax(scale * QK^T) ==
    # softmax(((scale*Wq) x + scale*bq) K^T).
    wq_t = (wq.T * SCALE).astype(jnp.bfloat16)
    wk_t = wk.T.astype(jnp.bfloat16)
    wv_t = wv.T.astype(jnp.bfloat16)
    bq2 = (bq * SCALE).reshape(1, D).astype(jnp.float32)
    bk2 = bk.reshape(1, D).astype(jnp.float32)
    bv2 = bv.reshape(1, D).astype(jnp.float32)

    # Stage 1: K/V projection (bf16 out, once per batch).
    k_proj, v_proj = project_kv(key, value, wk_t, wv_t, bk2, bv2)

    # Stage 2: attention.
    q_spec = pl.BlockSpec((1, tq, D), lambda b, i: (b, i, 0))
    kv_spec = pl.BlockSpec((1, S, D), lambda b, i: (b, 0, 0))
    w_spec = pl.BlockSpec((D, D), lambda b, i: (0, 0), pipeline_mode=pl.Buffered(1))
    b_spec = pl.BlockSpec((1, D), lambda b, i: (0, 0), pipeline_mode=pl.Buffered(1))
    out_spec = pl.BlockSpec((1, tq, D), lambda b, i: (b, i, 0))
    sm_spec = pl.BlockSpec((1, tq, S), lambda b, i: (b, i, 0))

    out, softmax_qk = pl.pallas_call(
        attention_kernel,
        out_shape=(
            jax.ShapeDtypeStruct((B, S, D), jnp.float32),
            jax.ShapeDtypeStruct((B, S, S), jnp.float32),
        ),
        grid_spec=pltpu.PrefetchScalarGridSpec(
            num_scalar_prefetch=0,
            grid=(B, n_q),
            in_specs=[q_spec, kv_spec, kv_spec, w_spec, b_spec],
            out_specs=[out_spec, sm_spec],
        ),
        compiler_params=pltpu.CompilerParams(
            dimension_semantics=("parallel", "parallel"),
            vmem_limit_bytes=32 * 1024 * 1024,
        ),
    )(query, k_proj, v_proj, wq_t, bq2)
    return out, softmax_qk


if __name__ == "__main__":
    # Small shapes consistent with the module (original: B=1, S=256, D=1024).
    B, S, D = 2, 256, 256
    TQ = 128

    root = jax.random.PRNGKey(0)
    keys = jax.random.split(root, 10)

    query = jax.random.normal(keys[0], (B, S, D), dtype=jnp.float32)
    # key = query + attn_mask * exp(-10000) ~= query (mask term underflows to 0)
    attn_mask = jax.random.normal(keys[1], (1, S, D), dtype=jnp.float32) * math.exp(-10000.0)
    key_in = query + attn_mask
    value = jax.random.normal(keys[2], (B, S, D), dtype=jnp.float32)

    # Deterministic Linear params (PyTorch layout: weight (out, in), bias (out,))
    bound = 1.0 / math.sqrt(D)
    wq = jax.random.uniform(keys[3], (D, D), jnp.float32, -bound, bound)
    wk = jax.random.uniform(keys[4], (D, D), jnp.float32, -bound, bound)
    wv = jax.random.uniform(keys[5], (D, D), jnp.float32, -bound, bound)
    bq = jax.random.uniform(keys[6], (D,), jnp.float32, -bound, bound)
    bk = jax.random.uniform(keys[7], (D,), jnp.float32, -bound, bound)
    bv = jax.random.uniform(keys[8], (D,), jnp.float32, -bound, bound)

    out, softmax_qk = model_forward(query, key_in, value, wq, wk, wv, bq, bk, bv, tq=TQ)
    jax.block_until_ready((out, softmax_qk))

    # Sanity check against a pure-JAX reference using the SAME numerics as the
    # kernel (bf16 MXU operands, f32 accumulation, SCALE folded into Wq/bq).
    # A pure-f32 reference would differ because scale=10 makes the softmax
    # extremely sharp and sensitive to bf16 rounding of the logits.
    def ref_matched(q_in, k_in, v_in):
        bf16, f32 = jnp.bfloat16, jnp.float32
        wq_t = (wq.T * SCALE).astype(bf16)
        wk_t = wk.T.astype(bf16)
        wv_t = wv.T.astype(bf16)
        q = (jnp.einsum("bsd,df->bsf", q_in.astype(bf16), wq_t,
                        preferred_element_type=f32) + bq * SCALE).astype(bf16)
        k = (jnp.einsum("bsd,df->bsf", k_in.astype(bf16), wk_t,
                        preferred_element_type=f32) + bk).astype(bf16)
        v = (jnp.einsum("bsd,df->bsf", v_in.astype(bf16), wv_t,
                        preferred_element_type=f32) + bv).astype(bf16)
        qk = jnp.einsum("bqd,bkd->bqk", q, k, preferred_element_type=f32)
        m = jnp.max(qk, axis=-1, keepdims=True)
        e = jnp.exp(qk - m)
        p = e / jnp.sum(e, axis=-1, keepdims=True)
        o = jnp.einsum("bqk,bkd->bqd", p.astype(bf16), v,
                       preferred_element_type=f32)
        return o, p

    out_ref, sm_ref = ref_matched(query, key_in, value)
    assert bool(jnp.allclose(softmax_qk, sm_ref, atol=1e-2, rtol=5e-2)), "softmax mismatch"
    assert bool(jnp.allclose(out, out_ref, atol=2e-2, rtol=5e-2)), "output mismatch"

    print("KERNEL_OK")
</pallas_src>

<mosaic_0001>
module attributes {stable_mosaic.version = 11 : i64} {
  func.func @kv_project_kernel(%arg0: i32, %arg1: memref<1x256x256xf32, #tpu.memory_space<vmem>>, %arg2: memref<1x256x256xf32, #tpu.memory_space<vmem>>, %arg3: memref<256x256xbf16, #tpu.memory_space<vmem>>, %arg4: memref<256x256xbf16, #tpu.memory_space<vmem>>, %arg5: memref<1x256xf32, #tpu.memory_space<vmem>>, %arg6: memref<1x256xf32, #tpu.memory_space<vmem>>, %arg7: memref<1x256x256xbf16, #tpu.memory_space<vmem>>, %arg8: memref<1x256x256xbf16, #tpu.memory_space<vmem>>) attributes {dimension_semantics = [#tpu.dimension_semantics<parallel>], iteration_bounds = array<i64: 2>, scalar_prefetch = 0 : i64, scratch_operands = 0 : i64, tpu.core_type = #tpu.core_type<tc>, window_params = [{transform_indices = @transform_0, window_bounds = array<i64: 1, 256, 256>}, {transform_indices = @transform_1, window_bounds = array<i64: 1, 256, 256>}, {pipeline_mode = #tpu.pipeline_mode<synchronous>, transform_indices = @transform_2, window_bounds = array<i64: 256, 256>}, {pipeline_mode = #tpu.pipeline_mode<synchronous>, transform_indices = @transform_3, window_bounds = array<i64: 256, 256>}, {pipeline_mode = #tpu.pipeline_mode<synchronous>, transform_indices = @transform_4, window_bounds = array<i64: 1, 256>}, {pipeline_mode = #tpu.pipeline_mode<synchronous>, transform_indices = @transform_5, window_bounds = array<i64: 1, 256>}, {transform_indices = @transform_6, window_bounds = array<i64: 1, 256, 256>}, {transform_indices = @transform_7, window_bounds = array<i64: 1, 256, 256>}]} {
    %c0 = arith.constant 0 : index
    %c0_0 = arith.constant 0 : index
    %c0_1 = arith.constant 0 : index
    %0 = vector.load %arg1[%c0, %c0_0, %c0_1] : memref<1x256x256xf32, #tpu.memory_space<vmem>>, vector<1x256x256xf32>
    %1 = vector.shape_cast %0 : vector<1x256x256xf32> to vector<256x256xf32>
    %2 = arith.truncf %1 : vector<256x256xf32> to vector<256x256xbf16>
    %c0_2 = arith.constant 0 : index
    %c0_3 = arith.constant 0 : index
    %c0_4 = arith.constant 0 : index
    %3 = vector.load %arg2[%c0_2, %c0_3, %c0_4] : memref<1x256x256xf32, #tpu.memory_space<vmem>>, vector<1x256x256xf32>
    %4 = vector.shape_cast %3 : vector<1x256x256xf32> to vector<256x256xf32>
    %5 = arith.truncf %4 : vector<256x256xf32> to vector<256x256xbf16>
    %c0_5 = arith.constant 0 : index
    %c0_6 = arith.constant 0 : index
    %6 = vector.load %arg3[%c0_5, %c0_6] : memref<256x256xbf16, #tpu.memory_space<vmem>>, vector<256x256xbf16>
    %cst = arith.constant dense<0.000000e+00> : vector<256x256xf32>
    %7 = tpu.matmul %2, %6, %cst {dimension_numbers = #tpu.dot_dimension_numbers<[1], [0], [0], [1], [0, 0, 1, 1], [], []>} : vector<256x256xbf16>, vector<256x256xbf16>, vector<256x256xf32> -> vector<256x256xf32>
    %c0_7 = arith.constant 0 : index
    %c0_8 = arith.constant 0 : index
    %8 = vector.load %arg5[%c0_7, %c0_8] : memref<1x256xf32, #tpu.memory_space<vmem>>, vector<1x256xf32>
    %9 = vector.broadcast %8 : vector<1x256xf32> to vector<256x256xf32>
    %10 = arith.addf %7, %9 : vector<256x256xf32>
    %c0_9 = arith.constant 0 : index
    %c0_10 = arith.constant 0 : index
    %11 = vector.load %arg4[%c0_9, %c0_10] : memref<256x256xbf16, #tpu.memory_space<vmem>>, vector<256x256xbf16>
    %cst_11 = arith.constant dense<0.000000e+00> : vector<256x256xf32>
    %12 = tpu.matmul %5, %11, %cst_11 {dimension_numbers = #tpu.dot_dimension_numbers<[1], [0], [0], [1], [0, 0, 1, 1], [], []>} : vector<256x256xbf16>, vector<256x256xbf16>, vector<256x256xf32> -> vector<256x256xf32>
    %c0_12 = arith.constant 0 : index
    %c0_13 = arith.constant 0 : index
    %13 = vector.load %arg6[%c0_12, %c0_13] : memref<1x256xf32, #tpu.memory_space<vmem>>, vector<1x256xf32>
    %14 = vector.broadcast %13 : vector<1x256xf32> to vector<256x256xf32>
    %15 = arith.addf %12, %14 : vector<256x256xf32>
    %16 = arith.truncf %10 : vector<256x256xf32> to vector<256x256xbf16>
    %c0_14 = arith.constant 0 : index
    %c0_15 = arith.constant 0 : index
    %c0_16 = arith.constant 0 : index
    %17 = vector.load %arg7[%c0_14, %c0_15, %c0_16] : memref<1x256x256xbf16, #tpu.memory_space<vmem>>, vector<1x256x256xbf16>
    %18 = vector.shape_cast %17 : vector<1x256x256xbf16> to vector<256x256xbf16>
    %19 = vector.shape_cast %16 : vector<256x256xbf16> to vector<1x256x256xbf16>
    tpu.vector_store %arg7[%c0_14, %c0_15, %c0_16], %19 {strides = array<i32>} : memref<1x256x256xbf16, #tpu.memory_space<vmem>>, vector<1x256x256xbf16>,
    %20 = arith.truncf %15 : vector<256x256xf32> to vector<256x256xbf16>
    %c0_17 = arith.constant 0 : index
    %c0_18 = arith.constant 0 : index
    %c0_19 = arith.constant 0 : index
    %21 = vector.load %arg8[%c0_17, %c0_18, %c0_19] : memref<1x256x256xbf16, #tpu.memory_space<vmem>>, vector<1x256x256xbf16>
    %22 = vector.shape_cast %21 : vector<1x256x256xbf16> to vector<256x256xbf16>
    %23 = vector.shape_cast %20 : vector<256x256xbf16> to vector<1x256x256xbf16>
    tpu.vector_store %arg8[%c0_17, %c0_18, %c0_19], %23 {strides = array<i32>} : memref<1x256x256xbf16, #tpu.memory_space<vmem>>, vector<1x256x256xbf16>,
    return
  }
  func.func @transform_0(%arg0: i32) -> (i32, i32, i32) {
    %c0_i32 = arith.constant 0 : i32
    %c0_i32_0 = arith.constant 0 : i32
    %c0_i32_1 = arith.constant 0 : i32
    return %arg0, %c0_i32, %c0_i32_0 : i32, i32, i32
  }
  func.func @transform_1(%arg0: i32) -> (i32, i32, i32) {
    %c0_i32 = arith.constant 0 : i32
    %c0_i32_0 = arith.constant 0 : i32
    %c0_i32_1 = arith.constant 0 : i32
    return %arg0, %c0_i32, %c0_i32_0 : i32, i32, i32
  }
  func.func @transform_2(%arg0: i32) -> (i32, i32) {
    %c0_i32 = arith.constant 0 : i32
    %c0_i32_0 = arith.constant 0 : i32
    %c0_i32_1 = arith.constant 0 : i32
    return %c0_i32, %c0_i32_0 : i32, i32
  }
  func.func @transform_3(%arg0: i32) -> (i32, i32) {
    %c0_i32 = arith.constant 0 : i32
    %c0_i32_0 = arith.constant 0 : i32
    %c0_i32_1 = arith.constant 0 : i32
    return %c0_i32, %c0_i32_0 : i32, i32
  }
  func.func @transform_4(%arg0: i32) -> (i32, i32) {
    %c0_i32 = arith.constant 0 : i32
    %c0_i32_0 = arith.constant 0 : i32
    %c0_i32_1 = arith.constant 0 : i32
    return %c0_i32, %c0_i32_0 : i32, i32
  }
  func.func @transform_5(%arg0: i32) -> (i32, i32) {
    %c0_i32 = arith.constant 0 : i32
    %c0_i32_0 = arith.constant 0 : i32
    %c0_i32_1 = arith.constant 0 : i32
    return %c0_i32, %c0_i32_0 : i32, i32
  }
  func.func @transform_6(%arg0: i32) -> (i32, i32, i32) {
    %c0_i32 = arith.constant 0 : i32
    %c0_i32_0 = arith.constant 0 : i32
    %c0_i32_1 = arith.constant 0 : i32
    return %arg0, %c0_i32, %c0_i32_0 : i32, i32, i32
  }
  func.func @transform_7(%arg0: i32) -> (i32, i32, i32) {
    %c0_i32 = arith.constant 0 : i32
    %c0_i32_0 = arith.constant 0 : i32
    %c0_i32_1 = arith.constant 0 : i32
    return %arg0, %c0_i32, %c0_i32_0 : i32, i32, i32
  }
}

</mosaic_0001>

<bundles_post_ra>
// kernel: tpu_custom_call.1
= control target key start
LH: loop header
LB: loop body
LE: loop exit
PB: predicated region body
PF: predicated region fallthrough
CT: control target
= control target key end

     0   :  { %s3347_s0 = inlined_call_operand.hbm [shape: f32[2,256,256], index: 0, kind: input, shape index: {}]   ;;  %s3348_s1 = inlined_call_operand.hbm [shape: f32[2,256,256], index: 1, kind: input, shape index: {}]   ;;  %s3349_s2 = inlined_call_operand.hbm [shape: bf16[256,256], index: 2, kind: input, shape index: {}]   ;;  %s3350_s3 = inlined_call_operand.hbm [shape: bf16[256,256], index: 3, kind: input, shape index: {}]   ;;  %s3351_s4 = inlined_call_operand.vmem [shape: f32[1,256], index: 4, kind: input, shape index: {}]   ;;  %s3352_s5 = inlined_call_operand.vmem [shape: f32[1,256], index: 5, kind: input, shape index: {}]   ;;  %s3353_s6 = inlined_call_operand.hbm [shape: bf16[2,256,256], index: 6, kind: output, shape index: {0}]   ;;  %s3354_s7 = inlined_call_operand.hbm [shape: bf16[2,256,256], index: 7, kind: output, shape index: {1}]  }
   0x1   :  { %3359 = sst [smem:[#allocation20_spill]] %s3347_s0 }
   0x2   :  { %3360 = sst [smem:[#allocation21_spill]] %s3349_s2 }
   0x3   :  { %3361 = sst [smem:[#allocation22_spill]] %s3350_s3 }
   0x4   :  { %13 = vsyncpa [#allocation3], 0 }
   0x5   :  { %15 = vsyncpa [#allocation3 + $0x1], 0 }
   0x6   :  { %16 = vsyncpa [#allocation6], 0 }
   0x7   :  { %18 = vsyncpa [#allocation6 + $0x1], 0 }
   0x8   :  { %19 = vsyncpa [#allocation9], 0 }
   0x9   :  { %20 = vsyncpa [#allocation4], 0 }
   0xa   :  { %22 = vsyncpa [#allocation4 + $0x1], 0 }
   0xb   :  { %23 = vsyncpa [#allocation12], 0 }
   0xc   :  { %25 = vsyncpa [#allocation12 + $0x1], 0  ;;  %s2674_s24 = smov 0   ;;  %s2676_s25 = smov 0  }
   0xd   :  { %s2678_s26 = smov 0   ;;  %s2680_s27 = smov 0  }
   0xe LB: > { %s2695_s28 = sadd.s32 4294967295, %s2620_s27   ;;  %s1993_s29 = sadd.s32 4294967294, %s2620_s27   ;;  %s2620_s27 = sphi %s2680_s27, %s3386_s27   ;;  %s2616_s26 = sphi %s2678_s26, %s3385_s26   ;;  %s2612_s25 = sphi %s2676_s25, %s3384_s25   ;;  %s2608_s24 = sphi %s2674_s24, %s3383_s24  }
   0xf   : > { %p51_p0 = scmp.ne.s32.totalorder %s2612_s25, %s2608_s24  ;;  %p3355_p1 = scmp.eq.s32.totalorder %s2695_s28, 0 }
  0x10   : > { %p191_p3 = scmp.eq.s32.totalorder %s1993_s29, 1  ;;  %p1994_p5 = scmp.ge.s32.totalorder %s2620_s27, 1 }
  0x11   : > { %p2704_p4 = por %p3355_p1, %p51_p0  ;;  %p224_p7 = scmp.lt.s32.totalorder %s2620_s27, 3 }
  0x12   : > { %p2709_p6 = por %p191_p3, %p51_p0  ;;  %s2622_s10 = smov [#allocation7]  }
  0x13   : > { %s3362_s30 = scalar_select %p2704_p4, 1, 0 }
  0x14   : > { %s3363_s8 = scalar_select %p2709_p6, 1, 0 }
  0x15   : > { %p2714_p8 = pnand %p1994_p5, %p224_p7  ;;  %s236_s11 = sshll.u32 %s2622_s10, 4  ;;  %s2718_s11 = int_to_ptr.vmem [resolvable:$true] %s236_s11 }
  0x16   : > { %s2623_s13 = smov [#allocation8]   ;;  %s3366_s2 = sld [smem:[#allocation21_spill]] }
  0x17   : > { %p2231_p9 = pneg %p2714_p8  ;;  %s249_s14 = sshll.u32 %s2623_s13, 4  ;;  %s2729_s14 = int_to_ptr.vmem [resolvable:$true] %s249_s14 }
  0x19   : > { %p2725_p11 = pnand %p2231_p9, %p3355_p1 }
  0x1b   : > { %p2396_p13 = pneg %p2725_p11 }
  0x1c   : > { %s2394_s17 = scalar_lea.hbm %s3366_s2, 4096 }
  0x1d   : > { %p2395_p12 = scmp.ne.s32.totalorder %s3366_s2, %s2394_s17  ;;  %p2401_p5 = scmp.lt.u32.totalorder %s2394_s17, %s3366_s2 }
  0x1f   : > { %p2397_p0 = pnand %p2396_p13, %p2395_p12 }
  0x21   : > { %p2398_p3 = pneg %p2397_p0 }
  0x23   : > { %p2403_p7 = pnand %p2401_p5, %p2398_p3 }
  0x25   : > { %2406 = shalt.err (!%p2403_p7)
}
  0x26   : > { %s2407_s22 = scalar_lea.vmem %s2718_s11, 4096  ;;  %p2415_p2 = scmp.lt.s32.totalorder %s2718_s11, %s2718_s11 }
  0x27   : > { %p2408_p9 = scmp.ne.s32.totalorder %s2718_s11, %s2407_s22  ;;  %p2416_p12 = scmp.lt.s32.totalorder %s2407_s22, %s2407_s22 }
  0x29   : > { %p2410_p10 = pnand %p2408_p9, %p2396_p13  ;;  %p2417_p0 = por %p2416_p12, %p2415_p2 }
  0x2b   : > { %p2411_p1 = pneg %p2410_p10 }
  0x2d   : > { %p2418_p6 = pnand %p2417_p0, %p2411_p1 }
  0x2f   : > { %2421 = shalt.err (!%p2418_p6)
}
  0x30   : > { %s2624_s23 = smov 128   ;;  %s2625_s29 = smov 8  }
  0x31   : > { %2234 = dma.hbm_to_vmem [thread:$0]  (!%p2725_p11), %s3366_s2, 4096, %s2718_s11, [#allocation6], %s2624_s23, %s2624_s23, %s2625_s29  }
  0x32   : > { %s3367_s3 = sld [smem:[#allocation22_spill]] }
  0x38   : > { %s2422_s17 = scalar_lea.hbm %s3367_s3, 4096 }
  0x39   : > { %p2423_p2 = scmp.ne.s32.totalorder %s3367_s3, %s2422_s17  ;;  %p2429_p10 = scmp.lt.u32.totalorder %s2422_s17, %s3367_s3 }
  0x3b   : > { %p2425_p1 = pnand %p2423_p2, %p2396_p13 }
  0x3d   : > { %p2426_p6 = pneg %p2425_p1 }
  0x3f   : > { %p2431_p3 = pnand %p2429_p10, %p2426_p6 }
  0x41   : > { %2434 = shalt.err (!%p2431_p3)
}
  0x42   : > { %s2435_s11 = scalar_lea.vmem %s2729_s14, 4096  ;;  %p2443_p12 = scmp.lt.s32.totalorder %s2729_s14, %s2729_s14 }
  0x43   : > { %p2436_p5 = scmp.ne.s32.totalorder %s2729_s14, %s2435_s11  ;;  %p2444_p0 = scmp.lt.s32.totalorder %s2435_s11, %s2435_s11 }
  0x45   : > { %p2438_p7 = pnand %p2436_p5, %p2396_p13  ;;  %p2445_p2 = por %p2444_p0, %p2443_p12 }
  0x47   : > { %p2439_p9 = pneg %p2438_p7 }
  0x49   : > { %p2446_p1 = pnand %p2445_p2, %p2439_p9 }
  0x4b   : > { %2449 = shalt.err (!%p2446_p1)
}
  0x4c   : > { %2237 = dma.hbm_to_vmem [thread:$0]  (!%p2725_p11), %s3367_s3, 4096, %s2729_s14, [#allocation9], %s2624_s23, %s2624_s23, %s2625_s29  }
  0x4d   : > { %s2784_s13 = sadd.s32 1, %s2620_s27   ;;  %s38_s12 = sadd.s32 1, %s2616_s26 }
  0x4e   : > { %s35_s15 = ssub.s32 %s2620_s27, %s2784_s13  ;;  %p45_p13 = scmp.ne.s32.totalorder %s2616_s26, %s2612_s25 }
  0x4f   : > { %p36_p6 = scmp.eq.s32.totalorder %s35_s15, 0  ;;  %p46_p10 = scmp.eq.s32.totalorder %s2620_s27, 0 }
  0x50   : > { %p3368_p3 = scmp.eq.s32.totalorder %s2695_s28, 1  ;;  %p2254_p7 = scmp.lt.s32.totalorder %s2620_s27, 2 }
  0x51   : > { %s2800_s17 = scalar_select %p36_p6, %s2616_s26, %s38_s12  }
  0x52   : > { %p2794_p5 = por %p3368_p3, %p45_p13  ;;  %p47_p9 = por %p46_p10, %p45_p13 }
  0x53   : > { %3370 = sst [smem:[#allocation19_spill]] %s2800_s17  ;;  %s269_s18 = sand.u32 1, %s2616_s26  }
  0x54   : > { %s3369_s16 = scalar_select %p2794_p5, 1, 0 }
  0x55   : > { %s2803_s19 = sshll.u32 %s269_s18, 9  ;;  %s3356_s14 = sshll.u32 %s2620_s27, 13 }
  0x56   : > { %s3371_s0 = sld [smem:[#allocation20_spill]]  ;;  %s273_s21 = scalar_lea.vmem [#allocation2], %s2803_s19 }
  0x57   : > { %s280_s11 = sshll.u32 %s273_s21, 4  ;;  %p2816_p11 = pnand %p2254_p7, %p47_p9  ;;  %s2814_s11 = int_to_ptr.vmem [resolvable:$true] %s280_s11 }
  0x58   : > { %s2820_s10 = scalar_lea.sflag [#allocation3], %s269_s18 }
  0x59   : > { %p2452_p0 = pneg %p2816_p11 }
  0x5c   : > { %s2811_s20 = scalar_lea.hbm %s3371_s0, %s3356_s14  ;;  %s2455_s29 = scalar_lea.hbm %s3371_s0, 16384 }
  0x5d   : > { %s2450_s12 = scalar_lea.hbm %s2811_s20, 8192  ;;  %p2456_p13 = scmp.lt.u32.totalorder %s2811_s20, %s3371_s0 }
  0x5e   : > { %p2451_p12 = scmp.ne.s32.totalorder %s2811_s20, %s2450_s12  ;;  %p2457_p6 = scmp.lt.u32.totalorder %s2455_s29, %s2450_s12 }
  0x5f   : > { %p2459_p3 = scmp.lt.u32.totalorder %s2450_s12, %s2811_s20 }
  0x60   : > { %p2453_p2 = pnand %p2452_p0, %p2451_p12  ;;  %p2458_p10 = por %p2457_p6, %p2456_p13 }
  0x62   : > { %p2454_p1 = pneg %p2453_p2  ;;  %p2460_p7 = por %p2459_p3, %p2458_p10 }
  0x64   : > { %p2461_p9 = pnand %p2460_p7, %p2454_p1 }
  0x66   : > { %2464 = shalt.err (!%p2461_p9)
}
  0x67   : > { %s2465_s18 = scalar_lea.vmem %s2814_s11, 8192  ;;  %s2626_s15 = smov [#allocation2]  }
  0x68   : > { %p2466_p12 = scmp.ne.s32.totalorder %s2814_s11, %s2465_s18  ;;  %s2470_s23 = sshll.u32 %s2626_s15, 4  ;;  %s2471_s23 = int_to_ptr.vmem [resolvable:$false] %s2470_s23 }
  0x69   : > { %s2472_s14 = scalar_lea.vmem %s2471_s23, 16384  ;;  %p2473_p4 = scmp.lt.s32.totalorder %s2814_s11, %s2471_s23 }
  0x6a   : > { %p2468_p2 = pnand %p2466_p12, %p2452_p0  ;;  %p2474_p13 = scmp.lt.s32.totalorder %s2472_s14, %s2465_s18 }
  0x6c   : > { %p2469_p5 = pneg %p2468_p2  ;;  %p2475_p6 = por %p2474_p13, %p2473_p4 }
  0x6e   : > { %p2476_p10 = pnand %p2475_p6, %p2469_p5 }
  0x70   : > { %2479 = shalt.err (!%p2476_p10)
}
  0x71   : > { %s2627_s12 = smov 256   ;;  %s2628_s29 = smov 16  }
  0x72   : > { %2241 = dma.hbm_to_vmem [thread:$0]  (!%p2816_p11), %s2811_s20, 8192, %s2814_s11, %s2820_s10, %s2627_s12, %s2627_s12, %s2628_s29  }
  0x73   : > { %s3373_s21 = sshll.u32 %s2620_s27, 13  ;;  %s294_s14 = scalar_lea.vmem [#allocation5], %s2803_s19 }
  0x74   : > { %s2856_s23 = scalar_lea.hbm %s3348_s1, %s3373_s21  ;;  %s301_s0 = sshll.u32 %s294_s14, 4  ;;  %s2859_s0 = int_to_ptr.vmem [resolvable:$true] %s301_s0 }
  0x75   : > { %s290_s2 = sand.u32 1, %s2620_s27   ;;  %s2480_s17 = scalar_lea.hbm %s2856_s23, 8192 }
  0x76   : > { %s2862_s3 = scalar_lea.sflag [#allocation6], %s290_s2  ;;  %p2481_p4 = scmp.ne.s32.totalorder %s2856_s23, %s2480_s17 }
  0x77   : > { %s2485_s10 = scalar_lea.hbm %s3348_s1, 16384  ;;  %p2486_p3 = scmp.lt.u32.totalorder %s2856_s23, %s3348_s1 }
  0x78   : > { %p2483_p5 = pnand %p2481_p4, %p2452_p0  ;;  %p2487_p7 = scmp.lt.u32.totalorder %s2485_s10, %s2480_s17 }
  0x79   : > { %p2489_p12 = scmp.lt.u32.totalorder %s2480_s17, %s2856_s23 }
  0x7a   : > { %p2484_p1 = pneg %p2483_p5  ;;  %p2488_p9 = por %p2487_p7, %p2486_p3 }
  0x7c   : > { %p2490_p2 = por %p2489_p12, %p2488_p9 }
  0x7e   : > { %p2491_p13 = pnand %p2490_p2, %p2484_p1 }
  0x80   : > { %2494 = shalt.err (!%p2491_p13)
}
  0x81   : > { %s2495_s2 = scalar_lea.vmem %s2859_s0, 8192  ;;  %s2629_s19 = smov [#allocation5]  }
  0x82   : > { %p2496_p6 = scmp.ne.s32.totalorder %s2859_s0, %s2495_s2  ;;  %s2500_s15 = sshll.u32 %s2629_s19, 4  ;;  %s2501_s15 = int_to_ptr.vmem [resolvable:$false] %s2500_s15 }
  0x83   : > { %s2502_s14 = scalar_lea.vmem %s2501_s15, 16384  ;;  %p2503_p5 = scmp.lt.s32.totalorder %s2859_s0, %s2501_s15 }
  0x84   : > { %p2498_p10 = pnand %p2496_p6, %p2452_p0  ;;  %p2504_p3 = scmp.lt.s32.totalorder %s2502_s14, %s2495_s2 }
  0x86   : > { %p2499_p4 = pneg %p2498_p10  ;;  %p2505_p7 = por %p2504_p3, %p2503_p5 }
  0x88   : > { %p2506_p9 = pnand %p2505_p7, %p2499_p4 }
  0x8a   : > { %2509 = shalt.err (!%p2506_p9)
}
  0x8b   : > { %2244 = dma.hbm_to_vmem [thread:$0]  (!%p2816_p11), %s2856_s23, 8192, %s2859_s0, %s2862_s3, %s2627_s12, %s2627_s12, %s2628_s29  }
  0x8c   : > { %313 = sbr.rel (%p2714_p8) target bundleno = 600 (0x258), region = 44  ;;  %s2894_s17 = sand.u32 (!%p2714_p8), 1, %s2612_s25  }
  0x8d   : > { %s2005_s20 = sshll.u32 (!%p2714_p8), %s2894_s17, 9  ;;  %s316_s11 = scalar_lea.sflag (!%p2714_p8), [#allocation3], %s2894_s17 }
  0x8e   : > { %s2898_s10 = scalar_lea.vmem (!%p2714_p8), [#allocation2], %s2005_s20  ;;  %p3374_p0 = scmp.ne.s32.totalorder (!%p2714_p8), %s3362_s30, 0 }
  0x93   : > { %2583 = dma.done.wait (%p3374_p0), %s316_s11, 8192  }
  0x94   : > { %2585 = vsyncadd (%p3374_p0), %s316_s11, 4294959104  ;;  %s324_s0 = sand.u32 1, %s2695_s28   ;;  %s2905_s9 = scalar_lea.vmem [#allocation5], %s2005_s20 }
  0x95   : > { %s325_s3 = scalar_lea.sflag [#allocation6], %s324_s0 }
  0x96   : > { %2587 = dma.done.wait (%p3374_p0), %s325_s3, 8192  }
  0x97   : > { %2589 = vsyncadd (%p3374_p0), %s325_s3, 4294959104  ;;  %p3375_p8 = scmp.eq.s32.totalorder %s2695_s28, 0 }
  0x99   : > { %2591 = dma.done.wait (%p3375_p8), [#allocation6], 4096   ;;  %p3376_p11 = pmov %p3375_p8 }
  0x9a   : > { %p3377_p1 = pmov %p3375_p8 }
  0x9b   : > { %2593 = vsyncadd (%p3376_p11), [#allocation6], 4294963200 }
  0x9c   : > { %2595 = dma.done.wait (%p3377_p1), [#allocation9], 4096   ;;  %p3378_p12 = pmov %p3377_p1 }
  0x9d   : > { %v2298_v0 = vld [vmem:[#allocation7 + $0x4] ss:$8 sps:$4 sm:$0xff]   ;;  %v2302_v2 = vld [vmem:[#allocation7] ss:$8 sps:$4 sm:$0xff]   ;;  %v2304_v4 = vld [vmem:[#allocation7 + $0x14] ss:$8 sps:$4 sm:$0xff]  }
  0x9e   : > { %2597 = vsyncadd (%p3378_p12), [#allocation9], 4294963200  ;;  %v2300_v1 = vld [vmem:[#allocation8 + $0x4] ss:$8 sps:$4 sm:$0xff]   ;;  %773 = vmatprep.subr.bf16.mxu0 %v2298_v0  ;;  %v2303_v3 = vld [vmem:[#allocation8] ss:$8 sps:$4 sm:$0xff]  }
  0x9f   : > { %1170 = vmatprep.subr.bf16.mxu1 %v2300_v1  ;;  %774 = vmatpush1.bf16.msra.mxu0 %v2302_v2  ;;  %v2306_v5 = vld [vmem:[#allocation8 + $0x14] ss:$8 sps:$4 sm:$0xff]   ;;  %v2308_v6 = vld [vmem:[#allocation7 + $0x10] ss:$8 sps:$4 sm:$0xff]   ;;  %v2310_v8 = vld [vmem:[#allocation7 + $0x24] ss:$8 sps:$4 sm:$0xff]  }
  0xa0   : > { %1171 = vmatpush1.bf16.msra.mxu1 %v2303_v3  ;;  %775 = vmatprep.subr.bf16.mxu0 %v2304_v4  ;;  %v2309_v7 = vld [vmem:[#allocation8 + $0x10] ss:$8 sps:$4 sm:$0xff]   ;;  %v2312_v9 = vld [vmem:[#allocation8 + $0x24] ss:$8 sps:$4 sm:$0xff]   ;;  %v2314_v10 = vld [vmem:[#allocation7 + $0x20] ss:$8 sps:$4 sm:$0xff]  }
  0xa1   : > { %1172 = vmatprep.subr.bf16.mxu1 %v2306_v5  ;;  %v2315_v11 = vld [vmem:[#allocation8 + $0x20] ss:$8 sps:$4 sm:$0xff]   ;;  %v2316_v12 = vld [vmem:[#allocation7 + $0x34] ss:$8 sps:$4 sm:$0xff]   ;;  %v2320_v14 = vld [vmem:[#allocation7 + $0x30] ss:$8 sps:$4 sm:$0xff]  }
  0xa2   : > { %v2318_v13 = vld [vmem:[#allocation8 + $0x34] ss:$8 sps:$4 sm:$0xff]   ;;  %v2321_v15 = vld [vmem:[#allocation8 + $0x30] ss:$8 sps:$4 sm:$0xff]   ;;  %v2322_v16 = vld [vmem:[#allocation7 + $0x44] ss:$8 sps:$4 sm:$0xff]  }
  0xa3   : > { %776 = vmatpush1.bf16.msra.mxu0 %v2308_v6  ;;  %v2324_v17 = vld [vmem:[#allocation8 + $0x44] ss:$8 sps:$4 sm:$0xff]   ;;  %v2326_v18 = vld [vmem:[#allocation7 + $0x40] ss:$8 sps:$4 sm:$0xff]   ;;  %v2328_v20 = vld [vmem:[#allocation7 + $0x54] ss:$8 sps:$4 sm:$0xff]  }
  0xa4   : > { %1173 = vmatpush1.bf16.msra.mxu1 %v2309_v7  ;;  %777 = vmatprep.subr.bf16.mxu0 %v2310_v8  ;;  %v2327_v19 = vld [vmem:[#allocation8 + $0x40] ss:$8 sps:$4 sm:$0xff]   ;;  %v2330_v21 = vld [vmem:[#allocation8 + $0x54] ss:$8 sps:$4 sm:$0xff]   ;;  %v2332_v22 = vld [vmem:[#allocation7 + $0x50] ss:$8 sps:$4 sm:$0xff]  }
  0xa5   : > { %1174 = vmatprep.subr.bf16.mxu1 %v2312_v9  ;;  %v2333_v23 = vld [vmem:[#allocation8 + $0x50] ss:$8 sps:$4 sm:$0xff]   ;;  %v2334_v24 = vld [vmem:[#allocation7 + $0x64] ss:$8 sps:$4 sm:$0xff]   ;;  %v2338_v26 = vld [vmem:[#allocation7 + $0x60] ss:$8 sps:$4 sm:$0xff]  }
  0xa6   : > { %v2336_v25 = vld [vmem:[#allocation8 + $0x64] ss:$8 sps:$4 sm:$0xff]   ;;  %v2339_v27 = vld [vmem:[#allocation8 + $0x60] ss:$8 sps:$4 sm:$0xff]   ;;  %v2340_v28 = vld [vmem:[#allocation7 + $0x74] ss:$8 sps:$4 sm:$0xff]  }
  0xa7   : > { %778 = vmatpush1.bf16.msra.mxu0 %v2314_v10  ;;  %v2342_v29 = vld [vmem:[#allocation8 + $0x74] ss:$8 sps:$4 sm:$0xff]   ;;  %v2344_v30 = vld [vmem:[#allocation7 + $0x70] ss:$8 sps:$4 sm:$0xff]   ;;  %v2346_v32 = vld [vmem:[#allocation7 + $0x84] ss:$8 sps:$4 sm:$0xff]  }
  0xa8   : > { %1175 = vmatpush1.bf16.msra.mxu1 %v2315_v11  ;;  %779 = vmatprep.subr.bf16.mxu0 %v2316_v12  ;;  %v2345_v31 = vld [vmem:[#allocation8 + $0x70] ss:$8 sps:$4 sm:$0xff]   ;;  %v2348_v33 = vld [vmem:[#allocation8 + $0x84] ss:$8 sps:$4 sm:$0xff]   ;;  %v2350_v34 = vld [vmem:[#allocation7 + $0x80] ss:$8 sps:$4 sm:$0xff]  }
  0xa9   : > { %1176 = vmatprep.subr.bf16.mxu1 %v2318_v13  ;;  %v2351_v35 = vld [vmem:[#allocation8 + $0x80] ss:$8 sps:$4 sm:$0xff]   ;;  %v2352_v36 = vld [vmem:[#allocation7 + $0x94] ss:$8 sps:$4 sm:$0xff]   ;;  %v2356_v38 = vld [vmem:[#allocation7 + $0x90] ss:$8 sps:$4 sm:$0xff]  }
  0xaa   : > { %v2354_v37 = vld [vmem:[#allocation8 + $0x94] ss:$8 sps:$4 sm:$0xff]   ;;  %v2357_v39 = vld [vmem:[#allocation8 + $0x90] ss:$8 sps:$4 sm:$0xff]   ;;  %v2358_v40 = vld [vmem:[#allocation7 + $0xa4] ss:$8 sps:$4 sm:$0xff]  }
  0xab   : > { %780 = vmatpush1.bf16.msra.mxu0 %v2320_v14  ;;  %v2360_v41 = vld [vmem:[#allocation8 + $0xa4] ss:$8 sps:$4 sm:$0xff]   ;;  %v2362_v42 = vld [vmem:[#allocation7 + $0xa0] ss:$8 sps:$4 sm:$0xff]   ;;  %v2364_v44 = vld [vmem:[#allocation7 + $0xb4] ss:$8 sps:$4 sm:$0xff]  }
  0xac   : > { %1177 = vmatpush1.bf16.msra.mxu1 %v2321_v15  ;;  %781 = vmatprep.subr.bf16.mxu0 %v2322_v16  ;;  %v2363_v43 = vld [vmem:[#allocation8 + $0xa0] ss:$8 sps:$4 sm:$0xff]   ;;  %v2366_v45 = vld [vmem:[#allocation8 + $0xb4] ss:$8 sps:$4 sm:$0xff]   ;;  %v2368_v50 = vld [vmem:[#allocation7 + $0xb0] ss:$8 sps:$4 sm:$0xff]  }
  0xad   : > { %1178 = vmatprep.subr.bf16.mxu1 %v2324_v17  ;;  %v378_v46 = vld [vmem:[%s2898_s10 + $0x8] sm:$0xff]  ;;  %v380_v47 = vld [vmem:[%s2898_s10 + $0x18] sm:$0xff]  ;;  %v377_v6 = vld [vmem:[%s2898_s10] sm:$0xff]  ;;  %s2009_s23 = sshll.u32 %s2894_s17, 8  ;;  %s2213_s2 = sshll.u32 %s2695_s28, 12 }
  0xae   : > { %v474_v48 = vld [vmem:[%s2905_s9 + $0x8] sm:$0xff]  ;;  %v476_v49 = vld [vmem:[%s2905_s9 + $0x18] sm:$0xff]  ;;  %v442_v52 = vpack.c.bf16 %v380_v47, %v378_v46  ;;  %v379_v7 = vld [vmem:[%s2898_s10 + $0x10] sm:$0xff]  ;;  %s3070_s21 = scalar_lea.vmem [#allocation10], %s2009_s23  ;;  %s3073_s18 = scalar_lea.vmem [#allocation11], %s2009_s23 }
  0xaf   : > { %782 = vmatpush1.bf16.msra.mxu0 %v2326_v18  ;;  %v2369_v51 = vld [vmem:[#allocation8 + $0xb0] ss:$8 sps:$4 sm:$0xff]   ;;  %v538_v53 = vpack.c.bf16 %v476_v49, %v474_v48  ;;  %v2370_v54 = vld [vmem:[#allocation7 + $0xc4] ss:$8 sps:$4 sm:$0xff]   ;;  %v2374_v56 = vld [vmem:[#allocation7 + $0xc0] ss:$8 sps:$4 sm:$0xff]   ;;  %v441_v14 = vpack.c.bf16 %v379_v7, %v377_v6  ;;  %s3259_s14 = scalar_lea.hbm %s3353_s6, %s2213_s2  ;;  %s3269_s0 = scalar_lea.hbm %s3354_s7, %s2213_s2 }
  0xb0   : > { %1179 = vmatpush1.bf16.msra.mxu1 %v2327_v19  ;;  %783 = vmatprep.subr.bf16.mxu0 %v2328_v20  ;;  %v2372_v55 = vld [vmem:[#allocation8 + $0xc4] ss:$8 sps:$4 sm:$0xff]   ;;  %v2375_v57 = vld [vmem:[#allocation8 + $0xc0] ss:$8 sps:$4 sm:$0xff]   ;;  %v2376_v58 = vld [vmem:[#allocation7 + $0xd4] ss:$8 sps:$4 sm:$0xff]  }
  0xb1   : > { %1180 = vmatprep.subr.bf16.mxu1 %v2330_v21  ;;  %805 = vmatprep.mubr.bf16.mxu0 %v442_v52  ;;  %v2378_v59 = vld [vmem:[#allocation8 + $0xd4] ss:$8 sps:$4 sm:$0xff]   ;;  %v2380_v60 = vld [vmem:[#allocation7 + $0xd0] ss:$8 sps:$4 sm:$0xff]   ;;  %v2382_v62 = vld [vmem:[#allocation7 + $0xe4] ss:$8 sps:$4 sm:$0xff]  }
  0xb2   : > { %1202 = vmatprep.mubr.bf16.mxu1 %v538_v53  ;;  %v2381_v61 = vld [vmem:[#allocation8 + $0xd0] ss:$8 sps:$4 sm:$0xff]   ;;  %v2384_v63 = vld [vmem:[#allocation8 + $0xe4] ss:$8 sps:$4 sm:$0xff]   ;;  %v2386_v0 = vld [vmem:[#allocation7 + $0xe0] ss:$8 sps:$4 sm:$0xff]  }
  0xb3   : > { %784 = vmatpush1.bf16.msra.mxu0 %v2332_v22  ;;  %v2387_v1 = vld [vmem:[#allocation8 + $0xe0] ss:$8 sps:$4 sm:$0xff]   ;;  %v2388_v2 = vld [vmem:[#allocation7 + $0xf4] ss:$8 sps:$4 sm:$0xff]   ;;  %v2392_v4 = vld [vmem:[#allocation7 + $0xf0] ss:$8 sps:$4 sm:$0xff]  }
  0xb4   : > { %1181 = vmatpush1.bf16.msra.mxu1 %v2333_v23  ;;  %785 = vmatprep.subr.bf16.mxu0 %v2334_v24  ;;  %v2390_v3 = vld [vmem:[#allocation8 + $0xf4] ss:$8 sps:$4 sm:$0xff]   ;;  %v2393_v5 = vld [vmem:[#allocation8 + $0xf0] ss:$8 sps:$4 sm:$0xff]   ;;  %v473_v8 = vld [vmem:[%s2905_s9] sm:$0xff]  ;;  %s1830_s19 = sshll.u32 %s3070_s21, 4  ;;  %s3262_s19 = int_to_ptr.vmem [resolvable:$true] %s1830_s19 }
  0xb5   : > { %1182 = vmatprep.subr.bf16.mxu1 %v2336_v25  ;;  %v475_v9 = vld [vmem:[%s2905_s9 + $0x10] sm:$0xff]  ;;  %v382_v10 = vld [vmem:[%s2898_s10 + $0x28] sm:$0xff]  ;;  %v384_v11 = vld [vmem:[%s2898_s10 + $0x38] sm:$0xff]  ;;  %s1846_s20 = sshll.u32 %s3073_s18, 4  ;;  %s1812_s3 = scalar_lea.sflag [#allocation4], %s2894_s17  ;;  %s3271_s20 = int_to_ptr.vmem [resolvable:$true] %s1846_s20 }
  0xb6   : > { %v478_v12 = vld [vmem:[%s2905_s9 + $0x28] sm:$0xff]  ;;  %v480_v13 = vld [vmem:[%s2905_s9 + $0x38] sm:$0xff]  ;;  %v537_v15 = vpack.c.bf16 %v475_v9, %v473_v8  ;;  %v444_v16 = vpack.c.bf16 %v384_v11, %v382_v10  ;;  %v381_v18 = vld [vmem:[%s2898_s10 + $0x20] sm:$0xff]  ;;  %p3379_p13 = scmp.ne.s32.totalorder %s3369_s16, 0  ;;  %s2630_s30 = smov [#allocation10]  }
  0xb7   : > { %786 = vmatpush1.bf16.msra.mxu0 %v2338_v26  ;;  %v540_v17 = vpack.c.bf16 %v480_v13, %v478_v12  ;;  %v383_v19 = vld [vmem:[%s2898_s10 + $0x30] sm:$0xff]  ;;  %v477_v20 = vld [vmem:[%s2905_s9 + $0x20] sm:$0xff]  ;;  %v386_v22 = vld [vmem:[%s2898_s10 + $0x48] sm:$0xff]  ;;  %s2514_s22 = sshll.u32 %s2630_s30, 4  ;;  %s2515_s22 = int_to_ptr.vmem [resolvable:$false] %s2514_s22 }
  0xb8   : > { %1183 = vmatpush1.bf16.msra.mxu1 %v2339_v27  ;;  %787 = vmatprep.subr.bf16.mxu0 %v2340_v28  ;;  %v479_v21 = vld [vmem:[%s2905_s9 + $0x30] sm:$0xff]  ;;  %v388_v23 = vld [vmem:[%s2898_s10 + $0x58] sm:$0xff]  ;;  %v482_v24 = vld [vmem:[%s2905_s9 + $0x48] sm:$0xff]  ;;  %v443_v26 = vpack.c.bf16 %v383_v19, %v381_v18  ;;  %s2516_s12 = scalar_lea.vmem %s2515_s22, 8192  ;;  %p2517_p4 = scmp.lt.s32.totalorder %s3262_s19, %s2515_s22 }
  0xb9   : > { %1184 = vmatprep.subr.bf16.mxu1 %v2342_v29  ;;  %v484_v25 = vld [vmem:[%s2905_s9 + $0x58] sm:$0xff]  ;;  %v539_v27 = vpack.c.bf16 %v479_v21, %v477_v20  ;;  %v446_v28 = vpack.c.bf16 %v388_v23, %v386_v22  ;;  %v394_v46 = vld [vmem:[%s2898_s10 + $0x88] sm:$0xff] }
  0xba   : > { %v542_v29 = vpack.c.bf16 %v484_v25, %v482_v24  ;;  %v396_v47 = vld [vmem:[%s2898_s10 + $0x98] sm:$0xff]  ;;  %v490_v48 = vld [vmem:[%s2905_s9 + $0x88] sm:$0xff] }
  0xbb   : > { %788 = vmatpush1.bf16.msra.mxu0 %v2344_v30  ;;  %v385_v30 = vld [vmem:[%s2898_s10 + $0x40] sm:$0xff]  ;;  %v492_v49 = vld [vmem:[%s2905_s9 + $0x98] sm:$0xff]  ;;  %v450_v52 = vpack.c.bf16 %v396_v47, %v394_v46  ;;  %v402_v6 = vld [vmem:[%s2898_s10 + $0xc8] sm:$0xff] }
  0xbc   : > { %1185 = vmatpush1.bf16.msra.mxu1 %v2345_v31  ;;  %789 = vmatprep.subr.bf16.mxu0 %v2346_v32  ;;  %v387_v31 = vld [vmem:[%s2898_s10 + $0x50] sm:$0xff]  ;;  %v481_v32 = vld [vmem:[%s2905_s9 + $0x40] sm:$0xff]  ;;  %v546_v53 = vpack.c.bf16 %v492_v49, %v490_v48  ;;  %v404_v7 = vld [vmem:[%s2898_s10 + $0xd8] sm:$0xff] }
  0xbd   : > { %1186 = vmatprep.subr.bf16.mxu1 %v2348_v33  ;;  %v483_v33 = vld [vmem:[%s2905_s9 + $0x50] sm:$0xff]  ;;  %v498_v8 = vld [vmem:[%s2905_s9 + $0xc8] sm:$0xff]  ;;  %v500_v9 = vld [vmem:[%s2905_s9 + $0xd8] sm:$0xff]  ;;  %v454_v12 = vpack.c.bf16 %v404_v7, %v402_v6 }
  0xbe   : > { %v550_v13 = vpack.c.bf16 %v500_v9, %v498_v8  ;;  %v406_v18 = vld [vmem:[%s2898_s10 + $0xe8] sm:$0xff]  ;;  %v408_v19 = vld [vmem:[%s2898_s10 + $0xf8] sm:$0xff] }
  0xbf   : > { %790 = vmatpush1.bf16.msra.mxu0 %v2350_v34  ;;  %v390_v34 = vld [vmem:[%s2898_s10 + $0x68] sm:$0xff]  ;;  %v504_v21 = vld [vmem:[%s2905_s9 + $0xf8] sm:$0xff]  ;;  %v456_v24 = vpack.c.bf16 %v408_v19, %v406_v18 }
  0xc0   : > { %1187 = vmatpush1.bf16.msra.mxu1 %v2351_v35  ;;  %791 = vmatprep.subr.bf16.mxu0 %v2352_v36  ;;  %v392_v35 = vld [vmem:[%s2898_s10 + $0x78] sm:$0xff]  ;;  %v486_v36 = vld [vmem:[%s2905_s9 + $0x68] sm:$0xff] }
  0xc1   : > { %1188 = vmatprep.subr.bf16.mxu1 %v2354_v37  ;;  %v488_v37 = vld [vmem:[%s2905_s9 + $0x78] sm:$0xff]  ;;  %v502_v20 = vld [vmem:[%s2905_s9 + $0xe8] sm:$0xff] }
  0xc2   : > { %v552_v25 = vpack.c.bf16 %v504_v21, %v502_v20 }
  0xc3   : > { %792 = vmatpush1.bf16.msra.mxu0 %v2356_v38  ;;  %v445_v38 = vpack.c.bf16 %v387_v31, %v385_v30  ;;  %v410_v30 = vld [vmem:[%s2898_s10 + $0x108] sm:$0xff]  ;;  %v412_v31 = vld [vmem:[%s2898_s10 + $0x118] sm:$0xff] }
  0xc4   : > { %1189 = vmatpush1.bf16.msra.mxu1 %v2357_v39  ;;  %793 = vmatprep.subr.bf16.mxu0 %v2358_v40  ;;  %v541_v39 = vpack.c.bf16 %v483_v33, %v481_v32  ;;  %v448_v40 = vpack.c.bf16 %v392_v35, %v390_v34  ;;  %v506_v32 = vld [vmem:[%s2905_s9 + $0x108] sm:$0xff]  ;;  %v508_v33 = vld [vmem:[%s2905_s9 + $0x118] sm:$0xff] }
  0xc5   : > { %1190 = vmatprep.subr.bf16.mxu1 %v2360_v41  ;;  %v544_v41 = vpack.c.bf16 %v488_v37, %v486_v36  ;;  %v458_v36 = vpack.c.bf16 %v412_v31, %v410_v30  ;;  %v554_v37 = vpack.c.bf16 %v508_v33, %v506_v32 }
  0xc7   : > { %794 = vmatpush1.bf16.msra.mxu0 %v2362_v42  ;;  %v389_v42 = vld [vmem:[%s2898_s10 + $0x60] sm:$0xff] }
  0xc8   : > { %1191 = vmatpush1.bf16.msra.mxu1 %v2363_v43  ;;  %795 = vmatprep.subr.bf16.mxu0 %v2364_v44  ;;  %v391_v43 = vld [vmem:[%s2898_s10 + $0x70] sm:$0xff]  ;;  %v485_v44 = vld [vmem:[%s2905_s9 + $0x60] sm:$0xff] }
  0xc9   : > { %1192 = vmatprep.subr.bf16.mxu1 %v2366_v45  ;;  %v487_v45 = vld [vmem:[%s2905_s9 + $0x70] sm:$0xff] }
  0xcb   : > { %796 = vmatpush1.bf16.msra.mxu0 %v2368_v50  ;;  %v447_v50 = vpack.c.bf16 %v391_v43, %v389_v42  ;;  %v414_v42 = vld [vmem:[%s2898_s10 + $0x128] sm:$0xff]  ;;  %v416_v43 = vld [vmem:[%s2898_s10 + $0x138] sm:$0xff] }
  0xcc   : > { %1193 = vmatpush1.bf16.msra.mxu1 %v2369_v51  ;;  %797 = vmatprep.subr.bf16.mxu0 %v2370_v54  ;;  %v543_v51 = vpack.c.bf16 %v487_v45, %v485_v44  ;;  %v393_v54 = vld [vmem:[%s2898_s10 + $0x80] sm:$0xff]  ;;  %v510_v44 = vld [vmem:[%s2905_s9 + $0x128] sm:$0xff]  ;;  %v512_v45 = vld [vmem:[%s2905_s9 + $0x138] sm:$0xff]  ;;  %v460_v48 = vpack.c.bf16 %v416_v43, %v414_v42 }
  0xcd   : > { %1194 = vmatprep.subr.bf16.mxu1 %v2372_v55  ;;  %v395_v55 = vld [vmem:[%s2898_s10 + $0x90] sm:$0xff]  ;;  %v556_v49 = vpack.c.bf16 %v512_v45, %v510_v44 }
  0xcf   : > { %798 = vmatpush1.bf16.msra.mxu0 %v2374_v56  ;;  %v489_v56 = vld [vmem:[%s2905_s9 + $0x80] sm:$0xff] }
  0xd0   : > { %1195 = vmatpush1.bf16.msra.mxu1 %v2375_v57  ;;  %799 = vmatprep.subr.bf16.mxu0 %v2376_v58  ;;  %v491_v57 = vld [vmem:[%s2905_s9 + $0x90] sm:$0xff]  ;;  %v398_v58 = vld [vmem:[%s2898_s10 + $0xa8] sm:$0xff] }
  0xd1   : > { %1196 = vmatprep.subr.bf16.mxu1 %v2378_v59  ;;  %v400_v59 = vld [vmem:[%s2898_s10 + $0xb8] sm:$0xff] }
  0xd3   : > { %800 = vmatpush1.bf16.msra.mxu0 %v2380_v60  ;;  %v494_v60 = vld [vmem:[%s2905_s9 + $0xa8] sm:$0xff] }
  0xd4   : > { %1197 = vmatpush1.bf16.msra.mxu1 %v2381_v61  ;;  %801 = vmatprep.subr.bf16.mxu0 %v2382_v62  ;;  %v496_v61 = vld [vmem:[%s2905_s9 + $0xb8] sm:$0xff]  ;;  %v449_v62 = vpack.c.bf16 %v395_v55, %v393_v54  ;;  %v418_v54 = vld [vmem:[%s2898_s10 + $0x148] sm:$0xff] }
  0xd5   : > { %1198 = vmatprep.subr.bf16.mxu1 %v2384_v63  ;;  %v545_v63 = vpack.c.bf16 %v491_v57, %v489_v56  ;;  %v420_v55 = vld [vmem:[%s2898_s10 + $0x158] sm:$0xff]  ;;  %v514_v56 = vld [vmem:[%s2905_s9 + $0x148] sm:$0xff] }
  0xd6   : > { %v516_v57 = vld [vmem:[%s2905_s9 + $0x158] sm:$0xff] }
  0xd7   : > { %802 = vmatpush1.bf16.msra.mxu0 %v2386_v0  ;;  %v452_v0 = vpack.c.bf16 %v400_v59, %v398_v58 }
  0xd8   : > { %1199 = vmatpush1.bf16.msra.mxu1 %v2387_v1  ;;  %803 = vmatprep.subr.bf16.mxu0 %v2388_v2  ;;  %v548_v1 = vpack.c.bf16 %v496_v61, %v494_v60  ;;  %v397_v2 = vld [vmem:[%s2898_s10 + $0xa0] sm:$0xff]  ;;  %v462_v60 = vpack.c.bf16 %v420_v55, %v418_v54  ;;  %v558_v61 = vpack.c.bf16 %v516_v57, %v514_v56 }
  0xd9   : > { %1200 = vmatprep.subr.bf16.mxu1 %v2390_v3  ;;  %v399_v3 = vld [vmem:[%s2898_s10 + $0xb0] sm:$0xff] }
  0xda   : > { %v451_v10 = vpack.c.bf16 %v399_v3, %v397_v2  ;;  %v422_v2 = vld [vmem:[%s2898_s10 + $0x168] sm:$0xff]  ;;  %v424_v3 = vld [vmem:[%s2898_s10 + $0x178] sm:$0xff] }
  0xdb   : > { %804 = vmatpush1.bf16.msra.mxu0 %v2392_v4  ;;  %v493_v4 = vld [vmem:[%s2905_s9 + $0xa0] sm:$0xff]  ;;  %v464_v8 = vpack.c.bf16 %v424_v3, %v422_v2 }
  0xdc   : > { %1201 = vmatpush1.bf16.msra.mxu1 %v2393_v5  ;;  %v495_v5 = vld [vmem:[%s2905_s9 + $0xb0] sm:$0xff]  ;;  %v601_v3 = vld [vmem:[%s3351_s4] sm:$0x3] }
  0xdd   : > { %v547_v11 = vpack.c.bf16 %v495_v5, %v493_v4  ;;  %v518_v4 = vld [vmem:[%s2905_s9 + $0x168] sm:$0xff]  ;;  %v520_v5 = vld [vmem:[%s2905_s9 + $0x178] sm:$0xff] }
  0xde   : > { %806 = vmatmul.mubr.bf16.vlgmr.msra.gmra.mrb[0].mxu0 %v441_v14  ;;  %v401_v14 = vld [vmem:[%s2898_s10 + $0xc0] sm:$0xff]  ;;  %v560_v9 = vpack.c.bf16 %v520_v5, %v518_v4 }
  0xdf   : > { %1203 = vmatmul.mubr.bf16.vlgmr.msra.gmra.mrb[0].mxu1 %v537_v15  ;;  %815 = vmatprep.mubr.bf16.mxu0 %v444_v16  ;;  %v403_v15 = vld [vmem:[%s2898_s10 + $0xd0] sm:$0xff]  ;;  %v497_v16 = vld [vmem:[%s2905_s9 + $0xc0] sm:$0xff] }
  0xe0   : > { %1212 = vmatprep.mubr.bf16.mxu1 %v540_v17  ;;  %v499_v17 = vld [vmem:[%s2905_s9 + $0xd0] sm:$0xff]  ;;  %v453_v22 = vpack.c.bf16 %v403_v15, %v401_v14  ;;  %v426_v14 = vld [vmem:[%s2898_s10 + $0x188] sm:$0xff]  ;;  %v428_v15 = vld [vmem:[%s2898_s10 + $0x198] sm:$0xff] }
  0xe1   : > { %v549_v23 = vpack.c.bf16 %v499_v17, %v497_v16  ;;  %v522_v16 = vld [vmem:[%s2905_s9 + $0x188] sm:$0xff]  ;;  %v524_v17 = vld [vmem:[%s2905_s9 + $0x198] sm:$0xff]  ;;  %v466_v20 = vpack.c.bf16 %v428_v15, %v426_v14  ;;  %v998_v4 = vld [vmem:[%s3352_s5] sm:$0x3] }
  0xe2   : > { %v562_v21 = vpack.c.bf16 %v524_v17, %v522_v16 }
  0xe6   : > { %816 = vmatmul.mubr.bf16.gmra.mrb[4].mxu0 %v443_v26  ;;  %v405_v26 = vld [vmem:[%s2898_s10 + $0xe0] sm:$0xff] }
  0xe7   : > { %1213 = vmatmul.mubr.bf16.gmra.mrb[4].mxu1 %v539_v27  ;;  %825 = vmatprep.mubr.bf16.mxu0 %v446_v28  ;;  %v407_v27 = vld [vmem:[%s2898_s10 + $0xf0] sm:$0xff]  ;;  %v501_v28 = vld [vmem:[%s2905_s9 + $0xe0] sm:$0xff] }
  0xe8   : > { %1222 = vmatprep.mubr.bf16.mxu1 %v542_v29  ;;  %v503_v29 = vld [vmem:[%s2905_s9 + $0xf0] sm:$0xff]  ;;  %v455_v34 = vpack.c.bf16 %v407_v27, %v405_v26  ;;  %v430_v26 = vld [vmem:[%s2898_s10 + $0x1a8] sm:$0xff]  ;;  %v432_v27 = vld [vmem:[%s2898_s10 + $0x1b8] sm:$0xff] }
  0xe9   : > { %v551_v35 = vpack.c.bf16 %v503_v29, %v501_v28  ;;  %v526_v28 = vld [vmem:[%s2905_s9 + $0x1a8] sm:$0xff]  ;;  %v528_v29 = vld [vmem:[%s2905_s9 + $0x1b8] sm:$0xff]  ;;  %v468_v32 = vpack.c.bf16 %v432_v27, %v430_v26 }
  0xea   : > { %v564_v33 = vpack.c.bf16 %v528_v29, %v526_v28 }
  0xee   : > { %826 = vmatmul.mubr.bf16.gmra.mrb[8].mxu0 %v445_v38  ;;  %v409_v38 = vld [vmem:[%s2898_s10 + $0x100] sm:$0xff] }
  0xef   : > { %1223 = vmatmul.mubr.bf16.gmra.mrb[8].mxu1 %v541_v39  ;;  %835 = vmatprep.mubr.bf16.mxu0 %v448_v40  ;;  %v411_v39 = vld [vmem:[%s2898_s10 + $0x110] sm:$0xff]  ;;  %v505_v40 = vld [vmem:[%s2905_s9 + $0x100] sm:$0xff] }
  0xf0   : > { %1232 = vmatprep.mubr.bf16.mxu1 %v544_v41  ;;  %v507_v41 = vld [vmem:[%s2905_s9 + $0x110] sm:$0xff]  ;;  %v457_v46 = vpack.c.bf16 %v411_v39, %v409_v38  ;;  %v434_v38 = vld [vmem:[%s2898_s10 + $0x1c8] sm:$0xff]  ;;  %v436_v39 = vld [vmem:[%s2898_s10 + $0x1d8] sm:$0xff] }
  0xf1   : > { %v553_v47 = vpack.c.bf16 %v507_v41, %v505_v40  ;;  %v530_v40 = vld [vmem:[%s2905_s9 + $0x1c8] sm:$0xff]  ;;  %v532_v41 = vld [vmem:[%s2905_s9 + $0x1d8] sm:$0xff]  ;;  %v470_v44 = vpack.c.bf16 %v436_v39, %v434_v38 }
  0xf2   : > { %v566_v45 = vpack.c.bf16 %v532_v41, %v530_v40 }
  0xf6   : > { %836 = vmatmul.mubr.bf16.gmra.mrb[12].mxu0 %v447_v50  ;;  %v413_v50 = vld [vmem:[%s2898_s10 + $0x120] sm:$0xff] }
  0xf7   : > { %1233 = vmatmul.mubr.bf16.gmra.mrb[12].mxu1 %v543_v51  ;;  %845 = vmatprep.mubr.bf16.mxu0 %v450_v52  ;;  %v415_v51 = vld [vmem:[%s2898_s10 + $0x130] sm:$0xff]  ;;  %v509_v52 = vld [vmem:[%s2905_s9 + $0x120] sm:$0xff] }
  0xf8   : > { %1242 = vmatprep.mubr.bf16.mxu1 %v546_v53  ;;  %v511_v53 = vld [vmem:[%s2905_s9 + $0x130] sm:$0xff]  ;;  %v459_v58 = vpack.c.bf16 %v415_v51, %v413_v50  ;;  %v438_v50 = vld [vmem:[%s2898_s10 + $0x1e8] sm:$0xff]  ;;  %v440_v51 = vld [vmem:[%s2898_s10 + $0x1f8] sm:$0xff] }
  0xf9   : > { %v555_v59 = vpack.c.bf16 %v511_v53, %v509_v52  ;;  %v534_v52 = vld [vmem:[%s2905_s9 + $0x1e8] sm:$0xff]  ;;  %v536_v53 = vld [vmem:[%s2905_s9 + $0x1f8] sm:$0xff]  ;;  %v472_v56 = vpack.c.bf16 %v440_v51, %v438_v50 }
  0xfa   : > { %v568_v57 = vpack.c.bf16 %v536_v53, %v534_v52 }
  0xfe   : > { %846 = vmatmul.mubr.bf16.gmra.mrb[16].mxu0 %v449_v62  ;;  %v417_v62 = vld [vmem:[%s2898_s10 + $0x140] sm:$0xff] }
  0xff   : > { %1243 = vmatmul.mubr.bf16.gmra.mrb[16].mxu1 %v545_v63  ;;  %855 = vmatprep.mubr.bf16.mxu0 %v452_v0  ;;  %v419_v63 = vld [vmem:[%s2898_s10 + $0x150] sm:$0xff]  ;;  %v513_v0 = vld [vmem:[%s2905_s9 + $0x140] sm:$0xff] }
 0x100   : > { %1252 = vmatprep.mubr.bf16.mxu1 %v548_v1  ;;  %v515_v1 = vld [vmem:[%s2905_s9 + $0x150] sm:$0xff]  ;;  %v461_v6 = vpack.c.bf16 %v419_v63, %v417_v62 }
 0x101   : > { %v557_v7 = vpack.c.bf16 %v515_v1, %v513_v0  ;;  %v603_v0 = vlaneseq }
 0x103   : > { %v604_v1 = vshrl.u32 %v603_v0, 7 }
 0x105   : > { %v605_v2 = vsub.s32 0, %v604_v1  ;;  %v609_v5 = vsub.s32 1, %v604_v1 }
 0x106   : > { %856 = vmatmul.mubr.bf16.gmra.mrb[20].mxu0 %v451_v10  ;;  %v421_v10 = vld [vmem:[%s2898_s10 + $0x160] sm:$0xff] }
 0x107   : > { %1253 = vmatmul.mubr.bf16.gmra.mrb[20].mxu1 %v547_v11  ;;  %865 = vmatprep.mubr.bf16.mxu0 %v454_v12  ;;  %v423_v11 = vld [vmem:[%s2898_s10 + $0x170] sm:$0xff]  ;;  %v517_v12 = vld [vmem:[%s2905_s9 + $0x160] sm:$0xff] }
 0x108   : > { %1262 = vmatprep.mubr.bf16.mxu1 %v550_v13  ;;  %v519_v13 = vld [vmem:[%s2905_s9 + $0x170] sm:$0xff]  ;;  %v463_v18 = vpack.c.bf16 %v423_v11, %v421_v10 }
 0x109   : > { %v559_v19 = vpack.c.bf16 %v519_v13, %v517_v12 }
 0x10e   : > { %866 = vmatmul.mubr.bf16.gmra.mrb[24].mxu0 %v453_v22  ;;  %v425_v22 = vld [vmem:[%s2898_s10 + $0x180] sm:$0xff] }
 0x10f   : > { %1263 = vmatmul.mubr.bf16.gmra.mrb[24].mxu1 %v549_v23  ;;  %875 = vmatprep.mubr.bf16.mxu0 %v456_v24  ;;  %v427_v23 = vld [vmem:[%s2898_s10 + $0x190] sm:$0xff]  ;;  %v521_v24 = vld [vmem:[%s2905_s9 + $0x180] sm:$0xff] }
 0x110   : > { %1272 = vmatprep.mubr.bf16.mxu1 %v552_v25  ;;  %v523_v25 = vld [vmem:[%s2905_s9 + $0x190] sm:$0xff]  ;;  %v465_v30 = vpack.c.bf16 %v427_v23, %v425_v22 }
 0x111   : > { %v561_v31 = vpack.c.bf16 %v523_v25, %v521_v24 }
 0x116   : > { %876 = vmatmul.mubr.bf16.gmra.mrb[28].mxu0 %v455_v34  ;;  %v429_v34 = vld [vmem:[%s2898_s10 + $0x1a0] sm:$0xff] }
 0x117   : > { %1273 = vmatmul.mubr.bf16.gmra.mrb[28].mxu1 %v551_v35  ;;  %885 = vmatprep.mubr.bf16.mxu0 %v458_v36  ;;  %v431_v35 = vld [vmem:[%s2898_s10 + $0x1b0] sm:$0xff]  ;;  %v525_v36 = vld [vmem:[%s2905_s9 + $0x1a0] sm:$0xff] }
 0x118   : > { %1282 = vmatprep.mubr.bf16.mxu1 %v554_v37  ;;  %v527_v37 = vld [vmem:[%s2905_s9 + $0x1b0] sm:$0xff]  ;;  %v467_v42 = vpack.c.bf16 %v431_v35, %v429_v34 }
 0x119   : > { %v563_v43 = vpack.c.bf16 %v527_v37, %v525_v36 }
 0x11e   : > { %886 = vmatmul.mubr.bf16.gmra.mrb[32].mxu0 %v457_v46  ;;  %v433_v46 = vld [vmem:[%s2898_s10 + $0x1c0] sm:$0xff] }
 0x11f   : > { %1283 = vmatmul.mubr.bf16.gmra.mrb[32].mxu1 %v553_v47  ;;  %895 = vmatprep.mubr.bf16.mxu0 %v460_v48  ;;  %v435_v47 = vld [vmem:[%s2898_s10 + $0x1d0] sm:$0xff]  ;;  %v529_v48 = vld [vmem:[%s2905_s9 + $0x1c0] sm:$0xff] }
 0x120   : > { %1292 = vmatprep.mubr.bf16.mxu1 %v556_v49  ;;  %v531_v49 = vld [vmem:[%s2905_s9 + $0x1d0] sm:$0xff]  ;;  %v469_v54 = vpack.c.bf16 %v435_v47, %v433_v46 }
 0x121   : > { %v565_v55 = vpack.c.bf16 %v531_v49, %v529_v48 }
 0x126   : > { %896 = vmatmul.mubr.bf16.gmra.mrb[36].mxu0 %v459_v58  ;;  %v437_v58 = vld [vmem:[%s2898_s10 + $0x1e0] sm:$0xff] }
 0x127   : > { %1293 = vmatmul.mubr.bf16.gmra.mrb[36].mxu1 %v555_v59  ;;  %905 = vmatprep.mubr.bf16.mxu0 %v462_v60  ;;  %v439_v59 = vld [vmem:[%s2898_s10 + $0x1f0] sm:$0xff]  ;;  %v533_v60 = vld [vmem:[%s2905_s9 + $0x1e0] sm:$0xff] }
 0x128   : > { %1302 = vmatprep.mubr.bf16.mxu1 %v558_v61  ;;  %v535_v61 = vld [vmem:[%s2905_s9 + $0x1f0] sm:$0xff]  ;;  %v471_v62 = vpack.c.bf16 %v439_v59, %v437_v58  ;;  %s2510_s9 = scalar_lea.vmem %s3262_s19, 4096 }
 0x129   : > { %v567_v63 = vpack.c.bf16 %v535_v61, %v533_v60  ;;  %p2511_p2 = scmp.ne.s32.totalorder %s3262_s19, %s2510_s9  ;;  %p2518_p5 = scmp.lt.s32.totalorder %s2516_s12, %s2510_s9 }
 0x12b   : > { %p2512_p6 = pnand %p2511_p2, %p3379_p13  ;;  %p2519_p3 = por %p2518_p5, %p2517_p4 }
 0x12d   : > { %p2513_p10 = pneg %p2512_p6 }
 0x12e   : > { %906 = vmatmul.mubr.bf16.gmra.mrb[40].mxu0 %v461_v6  ;;  %v3053_v6 = vrot.slane %v601_v3, %v605_v2 }
 0x12f   : > { %1303 = vmatmul.mubr.bf16.gmra.mrb[40].mxu1 %v557_v7  ;;  %915 = vmatprep.mubr.bf16.mxu0 %v464_v8  ;;  %v3055_v7 = vrot.slane %v998_v4, %v605_v2  ;;  %v3057_v8 = vrot.slane %v601_v3, %v609_v5  ;;  %p2520_p7 = pnand %p2519_p3, %p2513_p10 }
 0x130   : > { %1312 = vmatprep.mubr.bf16.mxu1 %v560_v9  ;;  %v3059_v9 = vrot.slane %v998_v4, %v609_v5 }
 0x136   : > { %916 = vmatmul.mubr.bf16.gmra.mrb[44].mxu0 %v463_v18 }
 0x137   : > { %1313 = vmatmul.mubr.bf16.gmra.mrb[44].mxu1 %v559_v19  ;;  %925 = vmatprep.mubr.bf16.mxu0 %v466_v20 }
 0x138   : > { %1322 = vmatprep.mubr.bf16.mxu1 %v562_v21 }
 0x13e   : > { %926 = vmatmul.mubr.bf16.gmra.mrb[48].mxu0 %v465_v30 }
 0x13f   : > { %1323 = vmatmul.mubr.bf16.gmra.mrb[48].mxu1 %v561_v31  ;;  %935 = vmatprep.mubr.bf16.mxu0 %v468_v32 }
 0x140   : > { %1332 = vmatprep.mubr.bf16.mxu1 %v564_v33 }
 0x146   : > { %936 = vmatmul.mubr.bf16.gmra.mrb[52].mxu0 %v467_v42 }
 0x147   : > { %1333 = vmatmul.mubr.bf16.gmra.mrb[52].mxu1 %v563_v43  ;;  %945 = vmatprep.mubr.bf16.mxu0 %v470_v44 }
 0x148   : > { %1342 = vmatprep.mubr.bf16.mxu1 %v566_v45 }
 0x14e   : > { %946 = vmatmul.mubr.bf16.gmra.mrb[56].mxu0 %v469_v54 }
 0x14f   : > { %1343 = vmatmul.mubr.bf16.gmra.mrb[56].mxu1 %v565_v55  ;;  %955 = vmatprep.mubr.bf16.mxu0 %v472_v56 }
 0x150   : > { %1352 = vmatprep.mubr.bf16.mxu1 %v568_v57 }
 0x156   : > { %956 = vmatmul.mubr.bf16.gmra.mrb[60].mxu0 %v471_v62 }
 0x157   : > { %1353 = vmatmul.mubr.bf16.gmra.mrb[60].mxu1 %v567_v63 }
 0x1b1   : > { %v807_v10 = vpop.f32.mrb[0].mxu0 }
 0x1b2   : > { %v1204_v11 = vpop.f32.mrb[0].mxu1  ;;  %v808_v12 = vadd.f32 %v807_v10, %v3053_v6  ;;  %v809_v14 = vpop.f32.mrb[1].mxu0 }
 0x1b3   : > { %v1205_v13 = vadd.f32 %v1204_v11, %v3055_v7  ;;  %v1206_v15 = vpop.f32.mrb[1].mxu1  ;;  %v810_v16 = vadd.f32 %v809_v14, %v3057_v8  ;;  %v811_v18 = vpop.f32.mrb[2].mxu0 }
 0x1b4   : > { %v1207_v17 = vadd.f32 %v1206_v15, %v3059_v9  ;;  %v1208_v19 = vpop.f32.mrb[2].mxu1  ;;  %v812_v20 = vadd.f32 %v811_v18, %v3053_v6  ;;  %v813_v22 = vpop.f32.mrb[3].mxu0 }
 0x1b5   : > { %v1209_v21 = vadd.f32 %v1208_v19, %v3055_v7  ;;  %v1210_v23 = vpop.f32.mrb[3].mxu1  ;;  %v2149_v24 = vpack.c.bf16 %v810_v16, %v808_v12  ;;  %v814_v26 = vadd.f32 %v813_v22, %v3057_v8 }
 0x1b6   : > { %v2181_v25 = vpack.c.bf16 %v1207_v17, %v1205_v13  ;;  %v1211_v27 = vadd.f32 %v1210_v23, %v3059_v9 }
 0x1b7   : > { %1555 = vst [vmem:[%s3070_s21] sm:$0xff] %v2149_v24  ;;  %v2150_v28 = vpack.c.bf16 %v814_v26, %v812_v20 }
 0x1b8   : > { %1779 = vst [vmem:[%s3073_s18] sm:$0xff] %v2181_v25  ;;  %v2182_v29 = vpack.c.bf16 %v1211_v27, %v1209_v21 }
 0x1b9   : > { %1556 = vst [vmem:[%s3070_s21 + $0x8] sm:$0xff] %v2150_v28  ;;  %v817_v30 = vpop.f32.mrb[4].mxu0 }
 0x1ba   : > { %1780 = vst [vmem:[%s3073_s18 + $0x8] sm:$0xff] %v2182_v29  ;;  %v1214_v31 = vpop.f32.mrb[4].mxu1  ;;  %v818_v32 = vadd.f32 %v817_v30, %v3053_v6  ;;  %v819_v34 = vpop.f32.mrb[5].mxu0 }
 0x1bb   : > { %v1215_v33 = vadd.f32 %v1214_v31, %v3055_v7  ;;  %v1216_v35 = vpop.f32.mrb[5].mxu1  ;;  %v820_v36 = vadd.f32 %v819_v34, %v3057_v8  ;;  %v821_v38 = vpop.f32.mrb[6].mxu0 }
 0x1bc   : > { %v1217_v37 = vadd.f32 %v1216_v35, %v3059_v9  ;;  %v1218_v39 = vpop.f32.mrb[6].mxu1  ;;  %v822_v40 = vadd.f32 %v821_v38, %v3053_v6  ;;  %v823_v42 = vpop.f32.mrb[7].mxu0 }
 0x1bd   : > { %v1219_v41 = vadd.f32 %v1218_v39, %v3055_v7  ;;  %v1220_v43 = vpop.f32.mrb[7].mxu1  ;;  %v2151_v44 = vpack.c.bf16 %v820_v36, %v818_v32  ;;  %v824_v46 = vadd.f32 %v823_v42, %v3057_v8 }
 0x1be   : > { %v2183_v45 = vpack.c.bf16 %v1217_v37, %v1215_v33  ;;  %v1221_v47 = vadd.f32 %v1220_v43, %v3059_v9 }
 0x1bf   : > { %1557 = vst [vmem:[%s3070_s21 + $0x10] sm:$0xff] %v2151_v44  ;;  %v2152_v48 = vpack.c.bf16 %v824_v46, %v822_v40 }
 0x1c0   : > { %1781 = vst [vmem:[%s3073_s18 + $0x10] sm:$0xff] %v2183_v45  ;;  %v2184_v49 = vpack.c.bf16 %v1221_v47, %v1219_v41 }
 0x1c1   : > { %1558 = vst [vmem:[%s3070_s21 + $0x18] sm:$0xff] %v2152_v48  ;;  %v827_v50 = vpop.f32.mrb[8].mxu0 }
 0x1c2   : > { %1782 = vst [vmem:[%s3073_s18 + $0x18] sm:$0xff] %v2184_v49  ;;  %v1224_v51 = vpop.f32.mrb[8].mxu1  ;;  %v828_v52 = vadd.f32 %v827_v50, %v3053_v6  ;;  %v829_v54 = vpop.f32.mrb[9].mxu0 }
 0x1c3   : > { %v1225_v53 = vadd.f32 %v1224_v51, %v3055_v7  ;;  %v1226_v55 = vpop.f32.mrb[9].mxu1  ;;  %v830_v56 = vadd.f32 %v829_v54, %v3057_v8  ;;  %v831_v58 = vpop.f32.mrb[10].mxu0 }
 0x1c4   : > { %v1227_v57 = vadd.f32 %v1226_v55, %v3059_v9  ;;  %v1228_v59 = vpop.f32.mrb[10].mxu1  ;;  %v832_v60 = vadd.f32 %v831_v58, %v3053_v6  ;;  %v833_v62 = vpop.f32.mrb[11].mxu0 }
 0x1c5   : > { %v1229_v61 = vadd.f32 %v1228_v59, %v3055_v7  ;;  %v1230_v63 = vpop.f32.mrb[11].mxu1  ;;  %v2153_v0 = vpack.c.bf16 %v830_v56, %v828_v52  ;;  %v834_v2 = vadd.f32 %v833_v62, %v3057_v8 }
 0x1c6   : > { %v2185_v1 = vpack.c.bf16 %v1227_v57, %v1225_v53  ;;  %v1231_v3 = vadd.f32 %v1230_v63, %v3059_v9 }
 0x1c7   : > { %1559 = vst [vmem:[%s3070_s21 + $0x20] sm:$0xff] %v2153_v0  ;;  %v2154_v4 = vpack.c.bf16 %v834_v2, %v832_v60 }
 0x1c8   : > { %1783 = vst [vmem:[%s3073_s18 + $0x20] sm:$0xff] %v2185_v1  ;;  %v2186_v5 = vpack.c.bf16 %v1231_v3, %v1229_v61 }
 0x1c9   : > { %1560 = vst [vmem:[%s3070_s21 + $0x28] sm:$0xff] %v2154_v4  ;;  %v837_v10 = vpop.f32.mrb[12].mxu0 }
 0x1ca   : > { %1784 = vst [vmem:[%s3073_s18 + $0x28] sm:$0xff] %v2186_v5  ;;  %v1234_v11 = vpop.f32.mrb[12].mxu1  ;;  %v838_v12 = vadd.f32 %v837_v10, %v3053_v6  ;;  %v839_v14 = vpop.f32.mrb[13].mxu0 }
 0x1cb   : > { %v1235_v13 = vadd.f32 %v1234_v11, %v3055_v7  ;;  %v1236_v15 = vpop.f32.mrb[13].mxu1  ;;  %v840_v16 = vadd.f32 %v839_v14, %v3057_v8  ;;  %v841_v18 = vpop.f32.mrb[14].mxu0 }
 0x1cc   : > { %v1237_v17 = vadd.f32 %v1236_v15, %v3059_v9  ;;  %v1238_v19 = vpop.f32.mrb[14].mxu1  ;;  %v842_v20 = vadd.f32 %v841_v18, %v3053_v6  ;;  %v843_v22 = vpop.f32.mrb[15].mxu0 }
 0x1cd   : > { %v1239_v21 = vadd.f32 %v1238_v19, %v3055_v7  ;;  %v1240_v23 = vpop.f32.mrb[15].mxu1  ;;  %v2155_v24 = vpack.c.bf16 %v840_v16, %v838_v12  ;;  %v844_v26 = vadd.f32 %v843_v22, %v3057_v8 }
 0x1ce   : > { %v2187_v25 = vpack.c.bf16 %v1237_v17, %v1235_v13  ;;  %v1241_v27 = vadd.f32 %v1240_v23, %v3059_v9 }
 0x1cf   : > { %1561 = vst [vmem:[%s3070_s21 + $0x30] sm:$0xff] %v2155_v24  ;;  %v2156_v28 = vpack.c.bf16 %v844_v26, %v842_v20 }
 0x1d0   : > { %1785 = vst [vmem:[%s3073_s18 + $0x30] sm:$0xff] %v2187_v25  ;;  %v2188_v29 = vpack.c.bf16 %v1241_v27, %v1239_v21 }
 0x1d1   : > { %1562 = vst [vmem:[%s3070_s21 + $0x38] sm:$0xff] %v2156_v28  ;;  %v847_v30 = vpop.f32.mrb[16].mxu0 }
 0x1d2   : > { %1786 = vst [vmem:[%s3073_s18 + $0x38] sm:$0xff] %v2188_v29  ;;  %v1244_v31 = vpop.f32.mrb[16].mxu1  ;;  %v848_v32 = vadd.f32 %v847_v30, %v3053_v6  ;;  %v849_v34 = vpop.f32.mrb[17].mxu0 }
 0x1d3   : > { %v1245_v33 = vadd.f32 %v1244_v31, %v3055_v7  ;;  %v1246_v35 = vpop.f32.mrb[17].mxu1  ;;  %v850_v36 = vadd.f32 %v849_v34, %v3057_v8  ;;  %v851_v38 = vpop.f32.mrb[18].mxu0 }
 0x1d4   : > { %v1247_v37 = vadd.f32 %v1246_v35, %v3059_v9  ;;  %v1248_v39 = vpop.f32.mrb[18].mxu1  ;;  %v852_v40 = vadd.f32 %v851_v38, %v3053_v6  ;;  %v853_v42 = vpop.f32.mrb[19].mxu0 }
 0x1d5   : > { %v1249_v41 = vadd.f32 %v1248_v39, %v3055_v7  ;;  %v1250_v43 = vpop.f32.mrb[19].mxu1  ;;  %v2157_v44 = vpack.c.bf16 %v850_v36, %v848_v32  ;;  %v854_v46 = vadd.f32 %v853_v42, %v3057_v8 }
 0x1d6   : > { %v2189_v45 = vpack.c.bf16 %v1247_v37, %v1245_v33  ;;  %v1251_v47 = vadd.f32 %v1250_v43, %v3059_v9 }
 0x1d7   : > { %1563 = vst [vmem:[%s3070_s21 + $0x40] sm:$0xff] %v2157_v44  ;;  %v2158_v48 = vpack.c.bf16 %v854_v46, %v852_v40 }
 0x1d8   : > { %1787 = vst [vmem:[%s3073_s18 + $0x40] sm:$0xff] %v2189_v45  ;;  %v2190_v49 = vpack.c.bf16 %v1251_v47, %v1249_v41 }
 0x1d9   : > { %1564 = vst [vmem:[%s3070_s21 + $0x48] sm:$0xff] %v2158_v48  ;;  %v857_v50 = vpop.f32.mrb[20].mxu0 }
 0x1da   : > { %1788 = vst [vmem:[%s3073_s18 + $0x48] sm:$0xff] %v2190_v49  ;;  %v1254_v51 = vpop.f32.mrb[20].mxu1  ;;  %v858_v52 = vadd.f32 %v857_v50, %v3053_v6  ;;  %v859_v54 = vpop.f32.mrb[21].mxu0 }
 0x1db   : > { %v1255_v53 = vadd.f32 %v1254_v51, %v3055_v7  ;;  %v1256_v55 = vpop.f32.mrb[21].mxu1  ;;  %v860_v56 = vadd.f32 %v859_v54, %v3057_v8  ;;  %v861_v58 = vpop.f32.mrb[22].mxu0 }
 0x1dc   : > { %v1257_v57 = vadd.f32 %v1256_v55, %v3059_v9  ;;  %v1258_v59 = vpop.f32.mrb[22].mxu1  ;;  %v862_v60 = vadd.f32 %v861_v58, %v3053_v6  ;;  %v863_v62 = vpop.f32.mrb[23].mxu0 }
 0x1dd   : > { %v1259_v61 = vadd.f32 %v1258_v59, %v3055_v7  ;;  %v1260_v63 = vpop.f32.mrb[23].mxu1  ;;  %v2159_v0 = vpack.c.bf16 %v860_v56, %v858_v52  ;;  %v864_v2 = vadd.f32 %v863_v62, %v3057_v8 }
 0x1de   : > { %v2191_v1 = vpack.c.bf16 %v1257_v57, %v1255_v53  ;;  %v1261_v3 = vadd.f32 %v1260_v63, %v3059_v9 }
 0x1df   : > { %1565 = vst [vmem:[%s3070_s21 + $0x50] sm:$0xff] %v2159_v0  ;;  %v2160_v4 = vpack.c.bf16 %v864_v2, %v862_v60 }
 0x1e0   : > { %1789 = vst [vmem:[%s3073_s18 + $0x50] sm:$0xff] %v2191_v1  ;;  %v2192_v5 = vpack.c.bf16 %v1261_v3, %v1259_v61 }
 0x1e1   : > { %1566 = vst [vmem:[%s3070_s21 + $0x58] sm:$0xff] %v2160_v4  ;;  %v867_v10 = vpop.f32.mrb[24].mxu0 }
 0x1e2   : > { %1790 = vst [vmem:[%s3073_s18 + $0x58] sm:$0xff] %v2192_v5  ;;  %v1264_v11 = vpop.f32.mrb[24].mxu1  ;;  %v868_v12 = vadd.f32 %v867_v10, %v3053_v6  ;;  %v869_v14 = vpop.f32.mrb[25].mxu0 }
 0x1e3   : > { %v1265_v13 = vadd.f32 %v1264_v11, %v3055_v7  ;;  %v1266_v15 = vpop.f32.mrb[25].mxu1  ;;  %v870_v16 = vadd.f32 %v869_v14, %v3057_v8  ;;  %v871_v18 = vpop.f32.mrb[26].mxu0 }
 0x1e4   : > { %v1267_v17 = vadd.f32 %v1266_v15, %v3059_v9  ;;  %v1268_v19 = vpop.f32.mrb[26].mxu1  ;;  %v872_v20 = vadd.f32 %v871_v18, %v3053_v6  ;;  %v873_v22 = vpop.f32.mrb[27].mxu0 }
 0x1e5   : > { %v1269_v21 = vadd.f32 %v1268_v19, %v3055_v7  ;;  %v1270_v23 = vpop.f32.mrb[27].mxu1  ;;  %v2161_v24 = vpack.c.bf16 %v870_v16, %v868_v12  ;;  %v874_v26 = vadd.f32 %v873_v22, %v3057_v8 }
 0x1e6   : > { %v2193_v25 = vpack.c.bf16 %v1267_v17, %v1265_v13  ;;  %v1271_v27 = vadd.f32 %v1270_v23, %v3059_v9 }
 0x1e7   : > { %1567 = vst [vmem:[%s3070_s21 + $0x60] sm:$0xff] %v2161_v24  ;;  %v2162_v28 = vpack.c.bf16 %v874_v26, %v872_v20 }
 0x1e8   : > { %1791 = vst [vmem:[%s3073_s18 + $0x60] sm:$0xff] %v2193_v25  ;;  %v2194_v29 = vpack.c.bf16 %v1271_v27, %v1269_v21 }
 0x1e9   : > { %1568 = vst [vmem:[%s3070_s21 + $0x68] sm:$0xff] %v2162_v28  ;;  %v877_v30 = vpop.f32.mrb[28].mxu0 }
 0x1ea   : > { %1792 = vst [vmem:[%s3073_s18 + $0x68] sm:$0xff] %v2194_v29  ;;  %v1274_v31 = vpop.f32.mrb[28].mxu1  ;;  %v878_v32 = vadd.f32 %v877_v30, %v3053_v6  ;;  %v879_v34 = vpop.f32.mrb[29].mxu0 }
 0x1eb   : > { %v1275_v33 = vadd.f32 %v1274_v31, %v3055_v7  ;;  %v1276_v35 = vpop.f32.mrb[29].mxu1  ;;  %v880_v36 = vadd.f32 %v879_v34, %v3057_v8  ;;  %v881_v38 = vpop.f32.mrb[30].mxu0 }
 0x1ec   : > { %v1277_v37 = vadd.f32 %v1276_v35, %v3059_v9  ;;  %v1278_v39 = vpop.f32.mrb[30].mxu1  ;;  %v882_v40 = vadd.f32 %v881_v38, %v3053_v6  ;;  %v883_v42 = vpop.f32.mrb[31].mxu0 }
 0x1ed   : > { %v1279_v41 = vadd.f32 %v1278_v39, %v3055_v7  ;;  %v1280_v43 = vpop.f32.mrb[31].mxu1  ;;  %v2163_v44 = vpack.c.bf16 %v880_v36, %v878_v32  ;;  %v884_v46 = vadd.f32 %v883_v42, %v3057_v8 }
 0x1ee   : > { %v2195_v45 = vpack.c.bf16 %v1277_v37, %v1275_v33  ;;  %v1281_v47 = vadd.f32 %v1280_v43, %v3059_v9 }
 0x1ef   : > { %1569 = vst [vmem:[%s3070_s21 + $0x70] sm:$0xff] %v2163_v44  ;;  %v2164_v48 = vpack.c.bf16 %v884_v46, %v882_v40 }
 0x1f0   : > { %1793 = vst [vmem:[%s3073_s18 + $0x70] sm:$0xff] %v2195_v45  ;;  %v2196_v49 = vpack.c.bf16 %v1281_v47, %v1279_v41 }
 0x1f1   : > { %1570 = vst [vmem:[%s3070_s21 + $0x78] sm:$0xff] %v2164_v48  ;;  %v887_v50 = vpop.f32.mrb[32].mxu0 }
 0x1f2   : > { %1794 = vst [vmem:[%s3073_s18 + $0x78] sm:$0xff] %v2196_v49  ;;  %v1284_v51 = vpop.f32.mrb[32].mxu1  ;;  %v888_v52 = vadd.f32 %v887_v50, %v3053_v6  ;;  %v889_v54 = vpop.f32.mrb[33].mxu0 }
 0x1f3   : > { %v1285_v53 = vadd.f32 %v1284_v51, %v3055_v7  ;;  %v1286_v55 = vpop.f32.mrb[33].mxu1  ;;  %v890_v56 = vadd.f32 %v889_v54, %v3057_v8  ;;  %v891_v58 = vpop.f32.mrb[34].mxu0 }
 0x1f4   : > { %v1287_v57 = vadd.f32 %v1286_v55, %v3059_v9  ;;  %v1288_v59 = vpop.f32.mrb[34].mxu1  ;;  %v892_v60 = vadd.f32 %v891_v58, %v3053_v6  ;;  %v893_v62 = vpop.f32.mrb[35].mxu0 }
 0x1f5   : > { %v1289_v61 = vadd.f32 %v1288_v59, %v3055_v7  ;;  %v1290_v63 = vpop.f32.mrb[35].mxu1  ;;  %v2165_v0 = vpack.c.bf16 %v890_v56, %v888_v52  ;;  %v894_v2 = vadd.f32 %v893_v62, %v3057_v8 }
 0x1f6   : > { %v2197_v1 = vpack.c.bf16 %v1287_v57, %v1285_v53  ;;  %v1291_v3 = vadd.f32 %v1290_v63, %v3059_v9 }
 0x1f7   : > { %1571 = vst [vmem:[%s3070_s21 + $0x80] sm:$0xff] %v2165_v0  ;;  %v2166_v4 = vpack.c.bf16 %v894_v2, %v892_v60 }
 0x1f8   : > { %1795 = vst [vmem:[%s3073_s18 + $0x80] sm:$0xff] %v2197_v1  ;;  %v2198_v5 = vpack.c.bf16 %v1291_v3, %v1289_v61 }
 0x1f9   : > { %1572 = vst [vmem:[%s3070_s21 + $0x88] sm:$0xff] %v2166_v4  ;;  %v897_v10 = vpop.f32.mrb[36].mxu0 }
 0x1fa   : > { %1796 = vst [vmem:[%s3073_s18 + $0x88] sm:$0xff] %v2198_v5  ;;  %v1294_v11 = vpop.f32.mrb[36].mxu1  ;;  %v898_v12 = vadd.f32 %v897_v10, %v3053_v6  ;;  %v899_v14 = vpop.f32.mrb[37].mxu0 }
 0x1fb   : > { %v1295_v13 = vadd.f32 %v1294_v11, %v3055_v7  ;;  %v1296_v15 = vpop.f32.mrb[37].mxu1  ;;  %v900_v16 = vadd.f32 %v899_v14, %v3057_v8  ;;  %v901_v18 = vpop.f32.mrb[38].mxu0 }
 0x1fc   : > { %v1297_v17 = vadd.f32 %v1296_v15, %v3059_v9  ;;  %v1298_v19 = vpop.f32.mrb[38].mxu1  ;;  %v902_v20 = vadd.f32 %v901_v18, %v3053_v6  ;;  %v903_v22 = vpop.f32.mrb[39].mxu0 }
 0x1fd   : > { %v1299_v21 = vadd.f32 %v1298_v19, %v3055_v7  ;;  %v1300_v23 = vpop.f32.mrb[39].mxu1  ;;  %v2167_v24 = vpack.c.bf16 %v900_v16, %v898_v12  ;;  %v904_v26 = vadd.f32 %v903_v22, %v3057_v8 }
 0x1fe   : > { %v2199_v25 = vpack.c.bf16 %v1297_v17, %v1295_v13  ;;  %v1301_v27 = vadd.f32 %v1300_v23, %v3059_v9 }
 0x1ff   : > { %1573 = vst [vmem:[%s3070_s21 + $0x90] sm:$0xff] %v2167_v24  ;;  %v2168_v28 = vpack.c.bf16 %v904_v26, %v902_v20 }
 0x200   : > { %1797 = vst [vmem:[%s3073_s18 + $0x90] sm:$0xff] %v2199_v25  ;;  %v2200_v29 = vpack.c.bf16 %v1301_v27, %v1299_v21 }
 0x201   : > { %1574 = vst [vmem:[%s3070_s21 + $0x98] sm:$0xff] %v2168_v28  ;;  %v907_v30 = vpop.f32.mrb[40].mxu0 }
 0x202   : > { %1798 = vst [vmem:[%s3073_s18 + $0x98] sm:$0xff] %v2200_v29  ;;  %v1304_v31 = vpop.f32.mrb[40].mxu1  ;;  %v908_v32 = vadd.f32 %v907_v30, %v3053_v6  ;;  %v909_v34 = vpop.f32.mrb[41].mxu0 }
 0x203   : > { %v1305_v33 = vadd.f32 %v1304_v31, %v3055_v7  ;;  %v1306_v35 = vpop.f32.mrb[41].mxu1  ;;  %v910_v36 = vadd.f32 %v909_v34, %v3057_v8  ;;  %v911_v38 = vpop.f32.mrb[42].mxu0 }
 0x204   : > { %v1307_v37 = vadd.f32 %v1306_v35, %v3059_v9  ;;  %v1308_v39 = vpop.f32.mrb[42].mxu1  ;;  %v912_v40 = vadd.f32 %v911_v38, %v3053_v6  ;;  %v913_v42 = vpop.f32.mrb[43].mxu0 }
 0x205   : > { %v1309_v41 = vadd.f32 %v1308_v39, %v3055_v7  ;;  %v1310_v43 = vpop.f32.mrb[43].mxu1  ;;  %v2169_v44 = vpack.c.bf16 %v910_v36, %v908_v32  ;;  %v914_v46 = vadd.f32 %v913_v42, %v3057_v8 }
 0x206   : > { %v2201_v45 = vpack.c.bf16 %v1307_v37, %v1305_v33  ;;  %v1311_v47 = vadd.f32 %v1310_v43, %v3059_v9 }
 0x207   : > { %1575 = vst [vmem:[%s3070_s21 + $0xa0] sm:$0xff] %v2169_v44  ;;  %v2170_v48 = vpack.c.bf16 %v914_v46, %v912_v40 }
 0x208   : > { %1799 = vst [vmem:[%s3073_s18 + $0xa0] sm:$0xff] %v2201_v45  ;;  %v2202_v49 = vpack.c.bf16 %v1311_v47, %v1309_v41 }
 0x209   : > { %1576 = vst [vmem:[%s3070_s21 + $0xa8] sm:$0xff] %v2170_v48  ;;  %v917_v50 = vpop.f32.mrb[44].mxu0 }
 0x20a   : > { %1800 = vst [vmem:[%s3073_s18 + $0xa8] sm:$0xff] %v2202_v49  ;;  %v1314_v51 = vpop.f32.mrb[44].mxu1  ;;  %v918_v52 = vadd.f32 %v917_v50, %v3053_v6  ;;  %v919_v54 = vpop.f32.mrb[45].mxu0 }
 0x20b   : > { %v1315_v53 = vadd.f32 %v1314_v51, %v3055_v7  ;;  %v1316_v55 = vpop.f32.mrb[45].mxu1  ;;  %v920_v56 = vadd.f32 %v919_v54, %v3057_v8  ;;  %v921_v58 = vpop.f32.mrb[46].mxu0 }
 0x20c   : > { %v1317_v57 = vadd.f32 %v1316_v55, %v3059_v9  ;;  %v1318_v59 = vpop.f32.mrb[46].mxu1  ;;  %v922_v60 = vadd.f32 %v921_v58, %v3053_v6  ;;  %v923_v62 = vpop.f32.mrb[47].mxu0 }
 0x20d   : > { %v1319_v61 = vadd.f32 %v1318_v59, %v3055_v7  ;;  %v1320_v63 = vpop.f32.mrb[47].mxu1  ;;  %v2171_v0 = vpack.c.bf16 %v920_v56, %v918_v52  ;;  %v924_v2 = vadd.f32 %v923_v62, %v3057_v8 }
 0x20e   : > { %v2203_v1 = vpack.c.bf16 %v1317_v57, %v1315_v53  ;;  %v1321_v3 = vadd.f32 %v1320_v63, %v3059_v9 }
 0x20f   : > { %1577 = vst [vmem:[%s3070_s21 + $0xb0] sm:$0xff] %v2171_v0  ;;  %v2172_v4 = vpack.c.bf16 %v924_v2, %v922_v60 }
 0x210   : > { %1801 = vst [vmem:[%s3073_s18 + $0xb0] sm:$0xff] %v2203_v1  ;;  %v2204_v5 = vpack.c.bf16 %v1321_v3, %v1319_v61 }
 0x211   : > { %1578 = vst [vmem:[%s3070_s21 + $0xb8] sm:$0xff] %v2172_v4  ;;  %v927_v10 = vpop.f32.mrb[48].mxu0 }
 0x212   : > { %1802 = vst [vmem:[%s3073_s18 + $0xb8] sm:$0xff] %v2204_v5  ;;  %v1324_v11 = vpop.f32.mrb[48].mxu1  ;;  %v928_v12 = vadd.f32 %v927_v10, %v3053_v6  ;;  %v929_v14 = vpop.f32.mrb[49].mxu0 }
 0x213   : > { %v1325_v13 = vadd.f32 %v1324_v11, %v3055_v7  ;;  %v1326_v15 = vpop.f32.mrb[49].mxu1  ;;  %v930_v16 = vadd.f32 %v929_v14, %v3057_v8  ;;  %v931_v18 = vpop.f32.mrb[50].mxu0 }
 0x214   : > { %v1327_v17 = vadd.f32 %v1326_v15, %v3059_v9  ;;  %v1328_v19 = vpop.f32.mrb[50].mxu1  ;;  %v932_v20 = vadd.f32 %v931_v18, %v3053_v6  ;;  %v933_v22 = vpop.f32.mrb[51].mxu0 }
 0x215   : > { %v1329_v21 = vadd.f32 %v1328_v19, %v3055_v7  ;;  %v1330_v23 = vpop.f32.mrb[51].mxu1  ;;  %v2173_v24 = vpack.c.bf16 %v930_v16, %v928_v12  ;;  %v934_v26 = vadd.f32 %v933_v22, %v3057_v8 }
 0x216   : > { %v2205_v25 = vpack.c.bf16 %v1327_v17, %v1325_v13  ;;  %v1331_v27 = vadd.f32 %v1330_v23, %v3059_v9 }
 0x217   : > { %1579 = vst [vmem:[%s3070_s21 + $0xc0] sm:$0xff] %v2173_v24  ;;  %v2174_v28 = vpack.c.bf16 %v934_v26, %v932_v20 }
 0x218   : > { %1803 = vst [vmem:[%s3073_s18 + $0xc0] sm:$0xff] %v2205_v25  ;;  %v2206_v29 = vpack.c.bf16 %v1331_v27, %v1329_v21 }
 0x219   : > { %1580 = vst [vmem:[%s3070_s21 + $0xc8] sm:$0xff] %v2174_v28  ;;  %v937_v30 = vpop.f32.mrb[52].mxu0 }
 0x21a   : > { %1804 = vst [vmem:[%s3073_s18 + $0xc8] sm:$0xff] %v2206_v29  ;;  %v1334_v31 = vpop.f32.mrb[52].mxu1  ;;  %v938_v32 = vadd.f32 %v937_v30, %v3053_v6  ;;  %v939_v34 = vpop.f32.mrb[53].mxu0 }
 0x21b   : > { %v1335_v33 = vadd.f32 %v1334_v31, %v3055_v7  ;;  %v1336_v35 = vpop.f32.mrb[53].mxu1  ;;  %v940_v36 = vadd.f32 %v939_v34, %v3057_v8  ;;  %v941_v38 = vpop.f32.mrb[54].mxu0 }
 0x21c   : > { %v1337_v37 = vadd.f32 %v1336_v35, %v3059_v9  ;;  %v1338_v39 = vpop.f32.mrb[54].mxu1  ;;  %v942_v40 = vadd.f32 %v941_v38, %v3053_v6  ;;  %v943_v42 = vpop.f32.mrb[55].mxu0 }
 0x21d   : > { %v1339_v41 = vadd.f32 %v1338_v39, %v3055_v7  ;;  %v1340_v43 = vpop.f32.mrb[55].mxu1  ;;  %v2175_v44 = vpack.c.bf16 %v940_v36, %v938_v32  ;;  %v944_v46 = vadd.f32 %v943_v42, %v3057_v8 }
 0x21e   : > { %v2207_v45 = vpack.c.bf16 %v1337_v37, %v1335_v33  ;;  %v1341_v47 = vadd.f32 %v1340_v43, %v3059_v9 }
 0x21f   : > { %1581 = vst [vmem:[%s3070_s21 + $0xd0] sm:$0xff] %v2175_v44  ;;  %v2176_v48 = vpack.c.bf16 %v944_v46, %v942_v40 }
 0x220   : > { %1805 = vst [vmem:[%s3073_s18 + $0xd0] sm:$0xff] %v2207_v45  ;;  %v2208_v49 = vpack.c.bf16 %v1341_v47, %v1339_v41 }
 0x221   : > { %1582 = vst [vmem:[%s3070_s21 + $0xd8] sm:$0xff] %v2176_v48  ;;  %v947_v50 = vpop.f32.mrb[56].mxu0 }
 0x222   : > { %1806 = vst [vmem:[%s3073_s18 + $0xd8] sm:$0xff] %v2208_v49  ;;  %v1344_v51 = vpop.f32.mrb[56].mxu1  ;;  %v948_v52 = vadd.f32 %v947_v50, %v3053_v6  ;;  %v949_v54 = vpop.f32.mrb[57].mxu0 }
 0x223   : > { %v1345_v53 = vadd.f32 %v1344_v51, %v3055_v7  ;;  %v1346_v55 = vpop.f32.mrb[57].mxu1  ;;  %v950_v56 = vadd.f32 %v949_v54, %v3057_v8  ;;  %v951_v58 = vpop.f32.mrb[58].mxu0 }
 0x224   : > { %v1347_v57 = vadd.f32 %v1346_v55, %v3059_v9  ;;  %v1348_v59 = vpop.f32.mrb[58].mxu1  ;;  %v952_v60 = vadd.f32 %v951_v58, %v3053_v6  ;;  %v953_v62 = vpop.f32.mrb[59].mxu0 }
 0x225   : > { %v1349_v61 = vadd.f32 %v1348_v59, %v3055_v7  ;;  %v1350_v63 = vpop.f32.mrb[59].mxu1  ;;  %v2177_v0 = vpack.c.bf16 %v950_v56, %v948_v52  ;;  %v954_v2 = vadd.f32 %v953_v62, %v3057_v8 }
 0x226   : > { %v2209_v1 = vpack.c.bf16 %v1347_v57, %v1345_v53  ;;  %v1351_v3 = vadd.f32 %v1350_v63, %v3059_v9 }
 0x227   : > { %1583 = vst [vmem:[%s3070_s21 + $0xe0] sm:$0xff] %v2177_v0  ;;  %v2178_v4 = vpack.c.bf16 %v954_v2, %v952_v60 }
 0x228   : > { %1807 = vst [vmem:[%s3073_s18 + $0xe0] sm:$0xff] %v2209_v1  ;;  %v2210_v5 = vpack.c.bf16 %v1351_v3, %v1349_v61 }
 0x229   : > { %1584 = vst [vmem:[%s3070_s21 + $0xe8] sm:$0xff] %v2178_v4  ;;  %v957_v10 = vpop.f32.mrb[60].mxu0 }
 0x22a   : > { %1808 = vst [vmem:[%s3073_s18 + $0xe8] sm:$0xff] %v2210_v5  ;;  %v1354_v11 = vpop.f32.mrb[60].mxu1  ;;  %v958_v12 = vadd.f32 %v957_v10, %v3053_v6  ;;  %v959_v14 = vpop.f32.mrb[61].mxu0 }
 0x22b   : > { %v1355_v13 = vadd.f32 %v1354_v11, %v3055_v7  ;;  %v1356_v15 = vpop.f32.mrb[61].mxu1  ;;  %v960_v16 = vadd.f32 %v959_v14, %v3057_v8  ;;  %v961_v18 = vpop.f32.mrb[62].mxu0 }
 0x22c   : > { %v1357_v17 = vadd.f32 %v1356_v15, %v3059_v9  ;;  %v1358_v19 = vpop.f32.mrb[62].mxu1  ;;  %v962_v20 = vadd.f32 %v961_v18, %v3053_v6  ;;  %v963_v22 = vpop.f32.mrb[63].mxu0 }
 0x22d   : > { %v1359_v21 = vadd.f32 %v1358_v19, %v3055_v7  ;;  %v1360_v23 = vpop.f32.mrb[63].mxu1  ;;  %v2179_v24 = vpack.c.bf16 %v960_v16, %v958_v12  ;;  %v964_v26 = vadd.f32 %v963_v22, %v3057_v8 }
 0x22e   : > { %v2211_v25 = vpack.c.bf16 %v1357_v17, %v1355_v13  ;;  %v1361_v27 = vadd.f32 %v1360_v23, %v3059_v9 }
 0x22f   : > { %1585 = vst [vmem:[%s3070_s21 + $0xf0] sm:$0xff] %v2179_v24  ;;  %v2180_v6 = vpack.c.bf16 %v964_v26, %v962_v20 }
 0x230   : > { %1809 = vst [vmem:[%s3073_s18 + $0xf0] sm:$0xff] %v2211_v25  ;;  %v2212_v7 = vpack.c.bf16 %v1361_v27, %v1359_v21 }
 0x231   : > { %1586 = vst [vmem:[%s3070_s21 + $0xf8] sm:$0xff] %v2180_v6 }
 0x232   : > { %1810 = vst [vmem:[%s3073_s18 + $0xf8] sm:$0xff] %v2212_v7 }
 0x233   : > { %2523 = shalt.err (!%p2520_p7)
}
 0x234   : > { %s2524_s29 = scalar_lea.hbm %s3259_s14, 4096  ;;  %s2528_s18 = scalar_lea.hbm %s3353_s6, 8192 }
 0x235   : > { %p2525_p9 = scmp.ne.s32.totalorder %s3259_s14, %s2524_s29  ;;  %p2529_p11 = scmp.lt.u32.totalorder %s3259_s14, %s3353_s6 }
 0x236   : > { %p2530_p1 = scmp.lt.u32.totalorder %s2528_s18, %s2524_s29  ;;  %p2532_p2 = scmp.lt.u32.totalorder %s2524_s29, %s3259_s14 }
 0x237   : > { %p2526_p0 = pnand %p2525_p9, %p3379_p13 }
 0x238   : > { %p2531_p12 = por %p2530_p1, %p2529_p11 }
 0x239   : > { %p2527_p8 = pneg %p2526_p0 }
 0x23a   : > { %p2533_p6 = por %p2532_p2, %p2531_p12 }
 0x23c   : > { %p2534_p10 = pnand %p2533_p6, %p2527_p8 }
 0x23e   : > { %2537 = shalt.err (!%p2534_p10)
}
 0x23f   : > { %s2631_s15 = smov 128   ;;  %s2632_s11 = smov 8  }
 0x240   : > { %2227 = dma.vmem_to_hbm [thread:$0]  (%p3379_p13), %s3262_s19, 4096, %s3259_s14, %s1812_s3, %s2631_s15, %s2631_s15, %s2632_s11  }
 0x241   : > { %s1817_s10 = scalar_lea.sflag [#allocation12], %s2894_s17  ;;  %s2538_s9 = scalar_lea.vmem %s3271_s20, 4096 }
 0x242   : > { %p2539_p4 = scmp.ne.s32.totalorder %s3271_s20, %s2538_s9  ;;  %s2633_s30 = smov [#allocation11]  }
 0x243   : > { %s2542_s22 = sshll.u32 %s2633_s30, 4  ;;  %s2543_s22 = int_to_ptr.vmem [resolvable:$false] %s2542_s22 }
 0x244   : > { %p2540_p5 = pnand %p2539_p4, %p3379_p13  ;;  %s2544_s12 = scalar_lea.vmem %s2543_s22, 8192 }
 0x245   : > { %p2545_p7 = scmp.lt.s32.totalorder %s3271_s20, %s2543_s22  ;;  %p2546_p9 = scmp.lt.s32.totalorder %s2544_s12, %s2538_s9 }
 0x246   : > { %p2541_p3 = pneg %p2540_p5 }
 0x247   : > { %p2547_p0 = por %p2546_p9, %p2545_p7 }
 0x249   : > { %p2548_p8 = pnand %p2547_p0, %p2541_p3 }
 0x24b   : > { %2551 = shalt.err (!%p2548_p8)
}
 0x24c   : > { %s2552_s19 = scalar_lea.hbm %s3269_s0, 4096  ;;  %s2556_s29 = scalar_lea.hbm %s3354_s7, 8192 }
 0x24d   : > { %p2553_p11 = scmp.ne.s32.totalorder %s3269_s0, %s2552_s19  ;;  %p2557_p2 = scmp.lt.u32.totalorder %s3269_s0, %s3354_s7 }
 0x24e   : > { %p2558_p6 = scmp.lt.u32.totalorder %s2556_s29, %s2552_s19  ;;  %p2560_p4 = scmp.lt.u32.totalorder %s2552_s19, %s3269_s0 }
 0x24f   : > { %p2554_p1 = pnand %p2553_p11, %p3379_p13 }
 0x250   : > { %p2559_p10 = por %p2558_p6, %p2557_p2 }
 0x251   : > { %p2555_p12 = pneg %p2554_p1 }
 0x252   : > { %p2561_p5 = por %p2560_p4, %p2559_p10 }
 0x254   : > { %p2562_p3 = pnand %p2561_p5, %p2555_p12 }
 0x256   : > { %2565 = shalt.err (!%p2562_p3)
}
 0x257   : > { %2228 = dma.vmem_to_hbm [thread:$0]  (%p3379_p13), %s3271_s20, 4096, %s3269_s0, %s1817_s10, %s2631_s15, %s2631_s15, %s2632_s11  }
 0x258 PF: > { %s1861_s18 = sand.u32 1, %s2608_s24   ;;  %p3380_p7 = scmp.ne.s32.totalorder %s3363_s8, 0 }
 0x259   : > { %p3381_p9 = scmp.ge.s32.totalorder %s2620_s27, 2  ;;  %s1862_s2 = scalar_lea.sflag [#allocation4], %s1861_s18 }
 0x25b   : > { %p2246_p0 = pnand %p3381_p9, %p3380_p7 }
 0x25d   : > { %2599 = dma.done.wait (!%p2246_p0), %s1862_s2, 4096  }
 0x25e   : > { %2601 = vsyncadd (!%p2246_p0), %s1862_s2, 4294963200  ;;  %s1871_s16 = scalar_lea.sflag [#allocation12], %s1861_s18 }
 0x25f   : > { %2603 = dma.done.wait (!%p2246_p0), %s1871_s16, 4096  }
 0x260   : > { %2605 = vsyncadd (!%p2246_p0), %s1871_s16, 4294963200  ;;  %s3382_s17 = sld [smem:[#allocation19_spill]]  ;;  %p28_p13 = scmp.ge.s32.totalorder %s2784_s13, 4  }
 0x261   : > { %s3383_s24 = smov %s2612_s25  ;;  %s3384_s25 = smov %s2616_s26 }
 0x262   : > { %s3386_s27 = smov %s2784_s13  ;;  %30 = sbr.rel (!%p28_p13) target bundleno = 14 (0xe), region = 127 }
 0x266   : > { %s3385_s26 = smov %s3382_s17 }
 0x269   :  { %1876 = vsyncpa [#allocation3], 1 }
 0x26a   :  { %1878 = vsyncpa [#allocation3 + $0x1], 1 }
 0x26b   :  { %1879 = vsyncpa [#allocation6], 1 }
 0x26c   :  { %1881 = vsyncpa [#allocation6 + $0x1], 1 }
 0x26d   :  { %1882 = vsyncpa [#allocation9], 1 }
 0x26e   :  { %1883 = vsyncpa [#allocation4], 1 }
 0x26f   :  { %1885 = vsyncpa [#allocation4 + $0x1], 1 }
 0x270   :  { %1886 = vsyncpa [#allocation12], 1 }
 0x271   :  { %1888 = vsyncpa [#allocation12 + $0x1], 1 }

</bundles_post_ra>
